<compile_context>
chip_gen: v7x
topology: tpu7x:2x2x1
jax: 0.10.0
libtpu: 0.0.40
codegen_flags: <defaults>
</compile_context>

<pallas_src>
import functools

import jax
import jax.numpy as jnp
from jax.experimental import pallas as pl
from jax.experimental.pallas import tpu as pltpu

BN_EPS = 1e-5


# ---------------------------------------------------------------------------
# Generation-aware VMEM budgets
# ---------------------------------------------------------------------------
def _detect_vmem_bytes():
    try:
        info = pltpu.get_tpu_info()
        for attr in ("vmem_capacity_bytes", "vmem_size_bytes", "vmem_bytes"):
            v = getattr(info, attr, None)
            if isinstance(v, int) and v > 0:
                return v
    except Exception:
        pass
    return 64 << 20  # conservative default (v7x-sized)


def _vmem_budgets():
    vmem = _detect_vmem_bytes()
    if vmem >= (96 << 20):
        # v5e / v6e: 128 MiB VMEM, single TensorCore -> fuse aggressively.
        return dict(fuse=48 << 20, tile_buf=48 << 20, cap=96 << 20,
                    big_tiled=1 << 60)
    # v7x-class: 64 MiB VMEM/TC but 2 TCs -> send any big single weight to the
    # tiled ("parallel") path so both cores participate in weight streaming.
    return dict(fuse=20 << 20, tile_buf=24 << 20, cap=48 << 20,
                big_tiled=8 << 20)


# ---------------------------------------------------------------------------
# Kernels
# ---------------------------------------------------------------------------
def _dequant_to_bf16(w_q):
    # int8 values are exactly representable in bf16; two-step convert keeps the
    # Mosaic lowering on well-trodden paths (s8 -> f32 -> bf16).
    return w_q.astype(jnp.float32).astype(jnp.bfloat16)


def _make_fused_kernel(num_bn, has_final):
    """[Linear->ReLU->BatchNorm1d] * num_bn (+ optional Linear->Tanh), fused.

    All weights / activations of the fused block stay resident in VMEM.
    Weights arrive as int8 + per-output-channel scale (row 0 of the packed
    vec); matmuls run bf16 x bf16 with f32 accumulation; BN math is f32.
    vec rows: [scale, bias, gamma, beta] (BN layers) / [scale, bias] (final).
    """
    assert num_bn > 0 or has_final

    def kernel(*refs):
        x_ref, out_ref = refs[0], refs[-1]
        h = x_ref[...].astype(jnp.bfloat16)
        hf = None
        idx = 1
        for _ in range(num_bn):
            w_ref, vec_ref = refs[idx], refs[idx + 1]
            idx += 2
            vec = vec_ref[...]
            acc = jnp.dot(h, _dequant_to_bf16(w_ref[...]),
                          preferred_element_type=jnp.float32)
            a = jnp.maximum(acc * vec[0:1, :] + vec[1:2, :], 0.0)      # dequant+bias, ReLU
            mean = jnp.mean(a, axis=0, keepdims=True)                   # BN (train mode)
            var = jnp.mean(jnp.square(a - mean), axis=0, keepdims=True)
            hf = (a - mean) * jax.lax.rsqrt(var + BN_EPS) * vec[2:3, :] + vec[3:4, :]
            h = hf.astype(jnp.bfloat16)
        if has_final:
            w_ref, vec_ref = refs[idx], refs[idx + 1]
            vec = vec_ref[...]
            acc = jnp.dot(h, _dequant_to_bf16(w_ref[...]),
                          preferred_element_type=jnp.float32)
            hf = jnp.tanh(acc * vec[0:1, :] + vec[1:2, :])
        out_ref[...] = hf.astype(out_ref.dtype)

    return kernel


def _linear_relu_bn_tiled_kernel(x_ref, w_ref, vec_ref, o_ref):
    # x: (B, K) bf16 (full batch!)   w: (K, tn) int8 (contiguous tile)
    # vec: (4, tn) f32 = [scale, bias, gamma, beta]   o: (B, tn)
    vec = vec_ref[...]
    acc = jnp.dot(x_ref[...], _dequant_to_bf16(w_ref[...]),
                  preferred_element_type=jnp.float32)
    a = jnp.maximum(acc * vec[0:1, :] + vec[1:2, :], 0.0)
    mean = jnp.mean(a, axis=0, keepdims=True)
    var = jnp.mean(jnp.square(a - mean), axis=0, keepdims=True)
    o_ref[...] = ((a - mean) * jax.lax.rsqrt(var + BN_EPS)
                  * vec[2:3, :] + vec[3:4, :]).astype(o_ref.dtype)


def _linear_tanh_tiled_kernel(x_ref, w_ref, vec_ref, o_ref):
    # vec: (2, tn) f32 = [scale, bias]
    vec = vec_ref[...]
    acc = jnp.dot(x_ref[...], _dequant_to_bf16(w_ref[...]),
                  preferred_element_type=jnp.float32)
    o_ref[...] = jnp.tanh(acc * vec[0:1, :] + vec[1:2, :]).astype(o_ref.dtype)


# ---------------------------------------------------------------------------
# Wrappers
# ---------------------------------------------------------------------------
def _fused_block(x, bn_layers, final_layer, budgets):
    """One pallas_call running several [Linear->ReLU->BN] layers (and
    optionally the final Linear->Tanh) with everything resident in VMEM."""
    B = x.shape[0]
    args = [x]
    w_bytes = 0
    flops = trans = 0
    out_n = x.shape[1]
    max_n = x.shape[1]
    for layer in bn_layers:
        K, N = layer["w_q"].shape
        args += [layer["w_q"], layer["vec"]]
        w_bytes += layer["w_q"].size + layer["vec"].size * 4
        flops += 2 * B * K * N
        trans += N                                   # rsqrt per feature
        max_n = max(max_n, N)
        out_n = N
    if final_layer is not None:
        K, N = final_layer["w_q"].shape
        args += [final_layer["w_q"], final_layer["vec"]]
        w_bytes += final_layer["w_q"].size + final_layer["vec"].size * 4
        flops += 2 * B * K * N
        trans += B * N                               # tanh
        max_n = max(max_n, N)
        out_n = N

    out_dtype = jnp.float32 if final_layer is not None else jnp.bfloat16
    act_bytes = B * x.shape[1] * 4 + B * out_n * 4 + 3 * B * max_n * 4
    bytes_acc = w_bytes + B * x.shape[1] * 4 + B * out_n * 4
    # No grid => no double-buffering: request roughly weights + activations +
    # a little headroom (not 2x).
    vmem_limit = int(min(budgets["cap"],
                         max(32 << 20, w_bytes + act_bytes + (8 << 20))))
    kernel = _make_fused_kernel(len(bn_layers), final_layer is not None)

    return pl.pallas_call(
        kernel,
        out_shape=jax.ShapeDtypeStruct((B, out_n), out_dtype),
        compiler_params=pltpu.CompilerParams(vmem_limit_bytes=vmem_limit),
        cost_estimate=pl.CostEstimate(flops=flops, transcendentals=trans,
                                      bytes_accessed=int(bytes_acc)),
    )(*args)


def _pick_tn(K, N, budget):
    # Largest lane-aligned tile that divides N and whose double-buffered int8
    # weight column fits the per-layer VMEM budget.
    for tn in (2048, 1024, 512, 256, 128):
        if N % tn == 0 and 2 * K * tn <= budget:
            return tn
    return N  # tiny / irregular feature dim: take it whole


def _w_block_spec(block_shape, index_map, triple_buffer):
    # Triple-buffer the streamed weight tiles when VMEM allows: at B=8 compute
    # is ~zero, so a 2-deep buffer exposes DMA-start latency every step.
    if triple_buffer and hasattr(pl, "Buffered"):
        try:
            return pl.BlockSpec(block_shape, index_map,
                                pipeline_mode=pl.Buffered(3))
        except TypeError:
            pass
    return pl.BlockSpec(block_shape, index_map)


def _feature_tiled_call(kernel, x, layer, *, out_dtype, transcendentals, budgets):
    """Feature-tiled Linear(+epilogue).  Streams contiguous tile-major weight
    tiles; the batch dimension is NEVER tiled (BatchNorm needs the full batch
    in every block — do not split B across cores here)."""
    w_tiles, vec_tiles = layer["w_tiles"], layer["vec_tiles"]
    B, K = x.shape
    nt, K2, tn = w_tiles.shape
    rows = vec_tiles.shape[1]
    assert K == K2, (K, K2)
    N = nt * tn

    x_bf = x.astype(jnp.bfloat16)        # cast once in XLA, not per grid step

    triple = 3 * K * tn <= budgets["tile_buf"]
    nbuf = 3 if triple else 2
    in_specs = [
        pl.BlockSpec((B, K), lambda j: (0, 0)),                      # resident acts
        _w_block_spec((None, K, tn), lambda j: (j, 0, 0), triple),   # contiguous W tile
        pl.BlockSpec((None, rows, tn), lambda j: (j, 0, 0)),         # packed scale/bias/BN
    ]

    out_itemsize = jnp.dtype(out_dtype).itemsize
    needed = (nbuf * K * tn                     # int8 W buffers
              + 2 * B * K * 2                   # bf16 activations
              + 2 * B * tn * out_itemsize       # output tiles
              + 2 * rows * tn * 4               # packed vec tiles
              + (4 << 20))                      # headroom
    vmem_limit = int(min(budgets["cap"], max(32 << 20, needed)))

    cost = pl.CostEstimate(
        flops=2 * B * K * N,
        transcendentals=int(transcendentals),
        bytes_accessed=int(K * N + B * K * 2 + rows * N * 4 + B * N * out_itemsize))

    return pl.pallas_call(
        kernel,
        out_shape=jax.ShapeDtypeStruct((B, N), out_dtype),
        grid_spec=pltpu.PrefetchScalarGridSpec(
            num_scalar_prefetch=0,
            grid=(nt,),
            in_specs=in_specs,
            out_specs=pl.BlockSpec((B, tn), lambda j: (0, j)),
        ),
        compiler_params=pltpu.CompilerParams(
            # "parallel" lets v7x shard the N-tile grid across its 2 TensorCores.
            dimension_semantics=("parallel",),
            vmem_limit_bytes=vmem_limit),
        cost_estimate=cost,
    )(x_bf, w_tiles, vec_tiles)


def linear_relu_bn_tiled(x, layer, budgets):
    nt, _, tn = layer["w_tiles"].shape
    return _feature_tiled_call(_linear_relu_bn_tiled_kernel, x, layer,
                               out_dtype=jnp.bfloat16,
                               transcendentals=nt * tn, budgets=budgets)


def linear_tanh_tiled(x, layer, budgets):
    nt, _, tn = layer["w_tiles"].shape
    return _feature_tiled_call(_linear_tanh_tiled_kernel, x, layer,
                               out_dtype=jnp.float32,
                               transcendentals=x.shape[0] * nt * tn,
                               budgets=budgets)


# ---------------------------------------------------------------------------
# Parameters: init (torch Linear init + int8 per-channel quantization),
# prepare (layout planning / tile-major re-layout, run ONCE at setup).
# ---------------------------------------------------------------------------
def _quantize_per_channel(w):
    amax = jnp.max(jnp.abs(w), axis=0)                       # (N,)
    scale = jnp.where(amax > 0, amax / 127.0, 1.0).astype(jnp.float32)
    w_q = jnp.clip(jnp.round(w / scale), -127, 127).astype(jnp.int8)
    return w_q, scale


def init_generator_params(key, latent_dim, hidden_dims, out_dim):
    dims = [latent_dim] + list(hidden_dims) + [out_dim]
    params = []
    for i in range(len(dims) - 1):
        fan_in, fan_out = dims[i], dims[i + 1]
        key, kw, kb = jax.random.split(key, 3)
        bound = 1.0 / (fan_in ** 0.5)
        w = jax.random.uniform(kw, (fan_in, fan_out), jnp.float32, -bound, bound)
        b = jax.random.uniform(kb, (fan_out,), jnp.float32, -bound, bound)
        w_q, scale = _quantize_per_channel(w)
        if i < len(dims) - 2:       # hidden layers carry BatchNorm affine params
            gamma = jnp.ones((fan_out,), jnp.float32)
            beta = jnp.zeros((fan_out,), jnp.float32)
            vec = jnp.stack([scale, b, gamma, beta], axis=0)   # (4, N)
        else:
            vec = jnp.stack([scale, b], axis=0)                # (2, N)
        params.append({"w_q": w_q, "vec": vec})
    return params


def _tile_layer(layer, budgets):
    w_q, vec = layer["w_q"], layer["vec"]
    K, N = w_q.shape
    tn = _pick_tn(K, N, budgets["tile_buf"])
    assert N % tn == 0
    nt = N // tn
    # Tile-major layout: each (K, tn) weight tile is one contiguous HBM chunk,
    # so each grid step is a single large DMA instead of K strided descriptors.
    w_tiles = jnp.transpose(w_q.reshape(K, nt, tn), (1, 0, 2))          # (nt, K, tn)
    vec_tiles = jnp.transpose(vec.reshape(vec.shape[0], nt, tn), (1, 0, 2))
    return {"w_tiles": w_tiles, "vec_tiles": vec_tiles}


def prepare_generator_params(params, force_tiled_min_bytes=None):
    """One-time re-layout: decide fused vs feature-tiled per layer and
    materialize tile-major int8 weights for the tiled layers."""
    budgets = _vmem_budgets()
    big_threshold = budgets["big_tiled"]
    if force_tiled_min_bytes is not None:
        big_threshold = force_tiled_min_bytes
    prepared = []
    for layer in params:
        wb = layer["w_q"].size                               # int8 bytes
        if wb > budgets["fuse"] or wb >= big_threshold:
            prepared.append(_tile_layer(layer, budgets))
        else:
            prepared.append(layer)
    return prepared


# ---------------------------------------------------------------------------
# Forward
# ---------------------------------------------------------------------------
@functools.partial(jax.jit, static_argnums=(2,))
def generator_forward(params, z, image_size):
    budgets = _vmem_budgets()
    h = z

    group, group_bytes = [], 0

    def run_group(h, group, final=None):
        if not group and final is None:
            return h
        return _fused_block(h, group, final, budgets)

    hidden, last = params[:-1], params[-1]
    for layer in hidden:
        if "w_tiles" in layer:                              # feature-tiled layer
            h = run_group(h, group)
            group, group_bytes = [], 0
            h = linear_relu_bn_tiled(h, layer, budgets)
        else:                                               # fused layer
            wb = layer["w_q"].size
            if group and group_bytes + wb > budgets["fuse"]:
                h = run_group(h, group)
                group, group_bytes = [], 0
            group.append(layer)
            group_bytes += wb

    if "w_tiles" in last:
        h = run_group(h, group)
        h = linear_tanh_tiled(h, last, budgets)
    else:
        wb = last["w_q"].size
        if group and group_bytes + wb > budgets["fuse"]:
            h = run_group(h, group)
            group = []
        h = run_group(h, group, final=last)

    # torch: self.model(z).view(z.shape[0], -1, H, W)  (row-major, NCHW)
    B = z.shape[0]
    return h.reshape(B, -1, image_size, image_size)


# ---------------------------------------------------------------------------
# Pure-JAX reference with identical numerics (int8-dequant weights, bf16
# activation casts, f32 accumulation / BN / tanh) for verification.
# ---------------------------------------------------------------------------
def _reference_forward(params, z, image_size):
    h = z
    for layer in params[:-1]:
        vec = layer["vec"]
        w = layer["w_q"].astype(jnp.float32).astype(jnp.bfloat16)
        acc = jnp.dot(h.astype(jnp.bfloat16), w,
                      preferred_element_type=jnp.float32)
        a = jnp.maximum(acc * vec[0:1] + vec[1:2], 0.0)
        mean = jnp.mean(a, axis=0, keepdims=True)
        var = jnp.mean(jnp.square(a - mean), axis=0, keepdims=True)
        h = (a - mean) * jax.lax.rsqrt(var + BN_EPS) * vec[2:3] + vec[3:4]
    last = params[-1]
    vec = last["vec"]
    w = last["w_q"].astype(jnp.float32).astype(jnp.bfloat16)
    acc = jnp.dot(h.astype(jnp.bfloat16), w, preferred_element_type=jnp.float32)
    h = jnp.tanh(acc * vec[0:1] + vec[1:2])
    return h.reshape(z.shape[0], -1, image_size, image_size)


# ---------------------------------------------------------------------------
if __name__ == "__main__":
    # Small shapes consistent with the module structure
    # (original: latent=100, hiddens 256..8192, output 3*128*128; scaled down
    #  here to stay tiny and TPU-tile friendly).
    B = 8
    LATENT_DIM = 64
    IMAGE_CHANNELS = 3
    IMAGE_SIZE = 16
    HIDDEN_DIMS = (128, 256, 256, 256, 128, 128)
    OUT_DIM = IMAGE_CHANNELS * IMAGE_SIZE * IMAGE_SIZE  # 768

    key = jax.random.PRNGKey(0)
    key, kz, kp = jax.random.split(key, 3)

    z = jax.random.normal(kz, (B, LATENT_DIM), jnp.float32)
    params = init_generator_params(kp, LATENT_DIM, HIDDEN_DIMS, OUT_DIM)

    ref = _reference_forward(params, z, IMAGE_SIZE)

    # --- fully fused path (the whole 7-layer MLP is one pallas_call) ---------
    prepared = prepare_generator_params(params)
    out = jax.block_until_ready(generator_forward(prepared, z, IMAGE_SIZE))

    assert out.shape == (B, IMAGE_CHANNELS, IMAGE_SIZE, IMAGE_SIZE), out.shape
    assert bool(jnp.all(jnp.isfinite(out)))
    assert bool(jnp.all(jnp.abs(out) <= 1.0 + 1e-6))          # tanh range
    err = float(jnp.max(jnp.abs(out - ref)))
    assert err < 2e-2, f"fused path mismatch: {err}"

    # --- feature-tiled path (what the full-size 8192x49152 layers use) -------
    # Force every layer through the tiled, tile-major, grid-parallel path.
    prepared_tiled = prepare_generator_params(params, force_tiled_min_bytes=0)
    out_t = jax.block_until_ready(generator_forward(prepared_tiled, z, IMAGE_SIZE))
    assert out_t.shape == (B, IMAGE_CHANNELS, IMAGE_SIZE, IMAGE_SIZE), out_t.shape
    err_t = float(jnp.max(jnp.abs(out_t - ref)))
    assert err_t < 2e-2, f"tiled path mismatch: {err_t}"

    print("KERNEL_OK")
</pallas_src>

<mosaic_0001>
module attributes {stable_mosaic.version = 11 : i64} {
  func.func @kernel(%arg0: memref<8x64xf32, #tpu.memory_space<vmem>>, %arg1: memref<64x128xi8, #tpu.memory_space<vmem>>, %arg2: memref<4x128xf32, #tpu.memory_space<vmem>>, %arg3: memref<128x256xi8, #tpu.memory_space<vmem>>, %arg4: memref<4x256xf32, #tpu.memory_space<vmem>>, %arg5: memref<256x256xi8, #tpu.memory_space<vmem>>, %arg6: memref<4x256xf32, #tpu.memory_space<vmem>>, %arg7: memref<256x256xi8, #tpu.memory_space<vmem>>, %arg8: memref<4x256xf32, #tpu.memory_space<vmem>>, %arg9: memref<256x128xi8, #tpu.memory_space<vmem>>, %arg10: memref<4x128xf32, #tpu.memory_space<vmem>>, %arg11: memref<128x128xi8, #tpu.memory_space<vmem>>, %arg12: memref<4x128xf32, #tpu.memory_space<vmem>>, %arg13: memref<128x768xi8, #tpu.memory_space<vmem>>, %arg14: memref<2x768xf32, #tpu.memory_space<vmem>>, %arg15: memref<8x768xf32, #tpu.memory_space<vmem>>) attributes {dimension_semantics = [], scalar_prefetch = 0 : i64, scratch_operands = 0 : i64, tpu.core_type = #tpu.core_type<tc>} {
    %c0 = arith.constant 0 : index
    %c0_0 = arith.constant 0 : index
    %0 = vector.load %arg0[%c0, %c0_0] : memref<8x64xf32, #tpu.memory_space<vmem>>, vector<8x64xf32>
    %1 = arith.truncf %0 : vector<8x64xf32> to vector<8x64xbf16>
    %c0_1 = arith.constant 0 : index
    %c0_2 = arith.constant 0 : index
    %2 = vector.load %arg2[%c0_1, %c0_2] : memref<4x128xf32, #tpu.memory_space<vmem>>, vector<4x128xf32>
    %c0_3 = arith.constant 0 : index
    %c0_4 = arith.constant 0 : index
    %3 = vector.load %arg1[%c0_3, %c0_4] : memref<64x128xi8, #tpu.memory_space<vmem>>, vector<64x128xi8>
    %4 = arith.sitofp %3 : vector<64x128xi8> to vector<64x128xf32>
    %5 = arith.truncf %4 : vector<64x128xf32> to vector<64x128xbf16>
    %cst = arith.constant dense<0.000000e+00> : vector<8x128xf32>
    %6 = tpu.matmul %1, %5, %cst {dimension_numbers = #tpu.dot_dimension_numbers<[1], [0], [0], [1], [0, 0, 1, 1], [], []>} : vector<8x64xbf16>, vector<64x128xbf16>, vector<8x128xf32> -> vector<8x128xf32>
    %7 = vector.extract_strided_slice %2 {offsets = [0, 0], sizes = [1, 128], strides = [1, 1]} : vector<4x128xf32> to vector<1x128xf32>
    %8 = vector.broadcast %7 : vector<1x128xf32> to vector<8x128xf32>
    %9 = arith.mulf %6, %8 : vector<8x128xf32>
    %10 = vector.extract_strided_slice %2 {offsets = [1, 0], sizes = [1, 128], strides = [1, 1]} : vector<4x128xf32> to vector<1x128xf32>
    %11 = vector.broadcast %10 : vector<1x128xf32> to vector<8x128xf32>
    %12 = arith.addf %9, %11 : vector<8x128xf32>
    %cst_5 = arith.constant 0.000000e+00 : f32
    %13 = vector.broadcast %cst_5 : f32 to vector<8x128xf32>
    %14 = arith.maximumf %12, %13 : vector<8x128xf32>
    %cst_6 = arith.constant dense<0.000000e+00> : vector<128xf32>
    %15 = vector.multi_reduction <add>, %14, %cst_6 [0] : vector<8x128xf32> to vector<128xf32>
    %16 = vector.shape_cast %15 : vector<128xf32> to vector<1x128xf32>
    %cst_7 = arith.constant 8.000000e+00 : f32
    %17 = vector.broadcast %cst_7 : f32 to vector<1x128xf32>
    %18 = arith.divf %16, %17 : vector<1x128xf32>
    %19 = vector.broadcast %18 : vector<1x128xf32> to vector<8x128xf32>
    %20 = arith.subf %14, %19 : vector<8x128xf32>
    %21 = arith.mulf %20, %20 : vector<8x128xf32>
    %cst_8 = arith.constant dense<0.000000e+00> : vector<128xf32>
    %22 = vector.multi_reduction <add>, %21, %cst_8 [0] : vector<8x128xf32> to vector<128xf32>
    %23 = vector.shape_cast %22 : vector<128xf32> to vector<1x128xf32>
    %cst_9 = arith.constant 8.000000e+00 : f32
    %24 = vector.broadcast %cst_9 : f32 to vector<1x128xf32>
    %25 = arith.divf %23, %24 : vector<1x128xf32>
    %26 = vector.broadcast %18 : vector<1x128xf32> to vector<8x128xf32>
    %27 = arith.subf %14, %26 : vector<8x128xf32>
    %cst_10 = arith.constant 9.99999974E-6 : f32
    %28 = vector.broadcast %cst_10 : f32 to vector<1x128xf32>
    %29 = arith.addf %25, %28 : vector<1x128xf32>
    %30 = math.rsqrt %29 : vector<1x128xf32>
    %31 = vector.broadcast %30 : vector<1x128xf32> to vector<8x128xf32>
    %32 = arith.mulf %27, %31 : vector<8x128xf32>
    %33 = vector.extract_strided_slice %2 {offsets = [2, 0], sizes = [1, 128], strides = [1, 1]} : vector<4x128xf32> to vector<1x128xf32>
    %34 = vector.broadcast %33 : vector<1x128xf32> to vector<8x128xf32>
    %35 = arith.mulf %32, %34 : vector<8x128xf32>
    %36 = vector.extract_strided_slice %2 {offsets = [3, 0], sizes = [1, 128], strides = [1, 1]} : vector<4x128xf32> to vector<1x128xf32>
    %37 = vector.broadcast %36 : vector<1x128xf32> to vector<8x128xf32>
    %38 = arith.addf %35, %37 : vector<8x128xf32>
    %39 = arith.truncf %38 : vector<8x128xf32> to vector<8x128xbf16>
    %c0_11 = arith.constant 0 : index
    %c0_12 = arith.constant 0 : index
    %40 = vector.load %arg4[%c0_11, %c0_12] : memref<4x256xf32, #tpu.memory_space<vmem>>, vector<4x256xf32>
    %c0_13 = arith.constant 0 : index
    %c0_14 = arith.constant 0 : index
    %41 = vector.load %arg3[%c0_13, %c0_14] : memref<128x256xi8, #tpu.memory_space<vmem>>, vector<128x256xi8>
    %42 = arith.sitofp %41 : vector<128x256xi8> to vector<128x256xf32>
    %43 = arith.truncf %42 : vector<128x256xf32> to vector<128x256xbf16>
    %cst_15 = arith.constant dense<0.000000e+00> : vector<8x256xf32>
    %44 = tpu.matmul %39, %43, %cst_15 {dimension_numbers = #tpu.dot_dimension_numbers<[1], [0], [0], [1], [0, 0, 1, 1], [], []>} : vector<8x128xbf16>, vector<128x256xbf16>, vector<8x256xf32> -> vector<8x256xf32>
    %45 = vector.extract_strided_slice %40 {offsets = [0, 0], sizes = [1, 256], strides = [1, 1]} : vector<4x256xf32> to vector<1x256xf32>
    %46 = vector.broadcast %45 : vector<1x256xf32> to vector<8x256xf32>
    %47 = arith.mulf %44, %46 : vector<8x256xf32>
    %48 = vector.extract_strided_slice %40 {offsets = [1, 0], sizes = [1, 256], strides = [1, 1]} : vector<4x256xf32> to vector<1x256xf32>
    %49 = vector.broadcast %48 : vector<1x256xf32> to vector<8x256xf32>
    %50 = arith.addf %47, %49 : vector<8x256xf32>
    %cst_16 = arith.constant 0.000000e+00 : f32
    %51 = vector.broadcast %cst_16 : f32 to vector<8x256xf32>
    %52 = arith.maximumf %50, %51 : vector<8x256xf32>
    %cst_17 = arith.constant dense<0.000000e+00> : vector<256xf32>
    %53 = vector.multi_reduction <add>, %52, %cst_17 [0] : vector<8x256xf32> to vector<256xf32>
    %54 = vector.shape_cast %53 : vector<256xf32> to vector<1x256xf32>
    %cst_18 = arith.constant 8.000000e+00 : f32
    %55 = vector.broadcast %cst_18 : f32 to vector<1x256xf32>
    %56 = arith.divf %54, %55 : vector<1x256xf32>
    %57 = vector.broadcast %56 : vector<1x256xf32> to vector<8x256xf32>
    %58 = arith.subf %52, %57 : vector<8x256xf32>
    %59 = arith.mulf %58, %58 : vector<8x256xf32>
    %cst_19 = arith.constant dense<0.000000e+00> : vector<256xf32>
    %60 = vector.multi_reduction <add>, %59, %cst_19 [0] : vector<8x256xf32> to vector<256xf32>
    %61 = vector.shape_cast %60 : vector<256xf32> to vector<1x256xf32>
    %cst_20 = arith.constant 8.000000e+00 : f32
    %62 = vector.broadcast %cst_20 : f32 to vector<1x256xf32>
    %63 = arith.divf %61, %62 : vector<1x256xf32>
    %64 = vector.broadcast %56 : vector<1x256xf32> to vector<8x256xf32>
    %65 = arith.subf %52, %64 : vector<8x256xf32>
    %cst_21 = arith.constant 9.99999974E-6 : f32
    %66 = vector.broadcast %cst_21 : f32 to vector<1x256xf32>
    %67 = arith.addf %63, %66 : vector<1x256xf32>
    %68 = math.rsqrt %67 : vector<1x256xf32>
    %69 = vector.broadcast %68 : vector<1x256xf32> to vector<8x256xf32>
    %70 = arith.mulf %65, %69 : vector<8x256xf32>
    %71 = vector.extract_strided_slice %40 {offsets = [2, 0], sizes = [1, 256], strides = [1, 1]} : vector<4x256xf32> to vector<1x256xf32>
    %72 = vector.broadcast %71 : vector<1x256xf32> to vector<8x256xf32>
    %73 = arith.mulf %70, %72 : vector<8x256xf32>
    %74 = vector.extract_strided_slice %40 {offsets = [3, 0], sizes = [1, 256], strides = [1, 1]} : vector<4x256xf32> to vector<1x256xf32>
    %75 = vector.broadcast %74 : vector<1x256xf32> to vector<8x256xf32>
    %76 = arith.addf %73, %75 : vector<8x256xf32>
    %77 = arith.truncf %76 : vector<8x256xf32> to vector<8x256xbf16>
    %c0_22 = arith.constant 0 : index
    %c0_23 = arith.constant 0 : index
    %78 = vector.load %arg6[%c0_22, %c0_23] : memref<4x256xf32, #tpu.memory_space<vmem>>, vector<4x256xf32>
    %c0_24 = arith.constant 0 : index
    %c0_25 = arith.constant 0 : index
    %79 = vector.load %arg5[%c0_24, %c0_25] : memref<256x256xi8, #tpu.memory_space<vmem>>, vector<256x256xi8>
    %80 = arith.sitofp %79 : vector<256x256xi8> to vector<256x256xf32>
    %81 = arith.truncf %80 : vector<256x256xf32> to vector<256x256xbf16>
    %cst_26 = arith.constant dense<0.000000e+00> : vector<8x256xf32>
    %82 = tpu.matmul %77, %81, %cst_26 {dimension_numbers = #tpu.dot_dimension_numbers<[1], [0], [0], [1], [0, 0, 1, 1], [], []>} : vector<8x256xbf16>, vector<256x256xbf16>, vector<8x256xf32> -> vector<8x256xf32>
    %83 = vector.extract_strided_slice %78 {offsets = [0, 0], sizes = [1, 256], strides = [1, 1]} : vector<4x256xf32> to vector<1x256xf32>
    %84 = vector.broadcast %83 : vector<1x256xf32> to vector<8x256xf32>
    %85 = arith.mulf %82, %84 : vector<8x256xf32>
    %86 = vector.extract_strided_slice %78 {offsets = [1, 0], sizes = [1, 256], strides = [1, 1]} : vector<4x256xf32> to vector<1x256xf32>
    %87 = vector.broadcast %86 : vector<1x256xf32> to vector<8x256xf32>
    %88 = arith.addf %85, %87 : vector<8x256xf32>
    %cst_27 = arith.constant 0.000000e+00 : f32
    %89 = vector.broadcast %cst_27 : f32 to vector<8x256xf32>
    %90 = arith.maximumf %88, %89 : vector<8x256xf32>
    %cst_28 = arith.constant dense<0.000000e+00> : vector<256xf32>
    %91 = vector.multi_reduction <add>, %90, %cst_28 [0] : vector<8x256xf32> to vector<256xf32>
    %92 = vector.shape_cast %91 : vector<256xf32> to vector<1x256xf32>
    %cst_29 = arith.constant 8.000000e+00 : f32
    %93 = vector.broadcast %cst_29 : f32 to vector<1x256xf32>
    %94 = arith.divf %92, %93 : vector<1x256xf32>
    %95 = vector.broadcast %94 : vector<1x256xf32> to vector<8x256xf32>
    %96 = arith.subf %90, %95 : vector<8x256xf32>
    %97 = arith.mulf %96, %96 : vector<8x256xf32>
    %cst_30 = arith.constant dense<0.000000e+00> : vector<256xf32>
    %98 = vector.multi_reduction <add>, %97, %cst_30 [0] : vector<8x256xf32> to vector<256xf32>
    %99 = vector.shape_cast %98 : vector<256xf32> to vector<1x256xf32>
    %cst_31 = arith.constant 8.000000e+00 : f32
    %100 = vector.broadcast %cst_31 : f32 to vector<1x256xf32>
    %101 = arith.divf %99, %100 : vector<1x256xf32>
    %102 = vector.broadcast %94 : vector<1x256xf32> to vector<8x256xf32>
    %103 = arith.subf %90, %102 : vector<8x256xf32>
    %cst_32 = arith.constant 9.99999974E-6 : f32
    %104 = vector.broadcast %cst_32 : f32 to vector<1x256xf32>
    %105 = arith.addf %101, %104 : vector<1x256xf32>
    %106 = math.rsqrt %105 : vector<1x256xf32>
    %107 = vector.broadcast %106 : vector<1x256xf32> to vector<8x256xf32>
    %108 = arith.mulf %103, %107 : vector<8x256xf32>
    %109 = vector.extract_strided_slice %78 {offsets = [2, 0], sizes = [1, 256], strides = [1, 1]} : vector<4x256xf32> to vector<1x256xf32>
    %110 = vector.broadcast %109 : vector<1x256xf32> to vector<8x256xf32>
    %111 = arith.mulf %108, %110 : vector<8x256xf32>
    %112 = vector.extract_strided_slice %78 {offsets = [3, 0], sizes = [1, 256], strides = [1, 1]} : vector<4x256xf32> to vector<1x256xf32>
    %113 = vector.broadcast %112 : vector<1x256xf32> to vector<8x256xf32>
    %114 = arith.addf %111, %113 : vector<8x256xf32>
    %115 = arith.truncf %114 : vector<8x256xf32> to vector<8x256xbf16>
    %c0_33 = arith.constant 0 : index
    %c0_34 = arith.constant 0 : index
    %116 = vector.load %arg8[%c0_33, %c0_34] : memref<4x256xf32, #tpu.memory_space<vmem>>, vector<4x256xf32>
    %c0_35 = arith.constant 0 : index
    %c0_36 = arith.constant 0 : index
    %117 = vector.load %arg7[%c0_35, %c0_36] : memref<256x256xi8, #tpu.memory_space<vmem>>, vector<256x256xi8>
    %118 = arith.sitofp %117 : vector<256x256xi8> to vector<256x256xf32>
    %119 = arith.truncf %118 : vector<256x256xf32> to vector<256x256xbf16>
    %cst_37 = arith.constant dense<0.000000e+00> : vector<8x256xf32>
    %120 = tpu.matmul %115, %119, %cst_37 {dimension_numbers = #tpu.dot_dimension_numbers<[1], [0], [0], [1], [0, 0, 1, 1], [], []>} : vector<8x256xbf16>, vector<256x256xbf16>, vector<8x256xf32> -> vector<8x256xf32>
    %121 = vector.extract_strided_slice %116 {offsets = [0, 0], sizes = [1, 256], strides = [1, 1]} : vector<4x256xf32> to vector<1x256xf32>
    %122 = vector.broadcast %121 : vector<1x256xf32> to vector<8x256xf32>
    %123 = arith.mulf %120, %122 : vector<8x256xf32>
    %124 = vector.extract_strided_slice %116 {offsets = [1, 0], sizes = [1, 256], strides = [1, 1]} : vector<4x256xf32> to vector<1x256xf32>
    %125 = vector.broadcast %124 : vector<1x256xf32> to vector<8x256xf32>
    %126 = arith.addf %123, %125 : vector<8x256xf32>
    %cst_38 = arith.constant 0.000000e+00 : f32
    %127 = vector.broadcast %cst_38 : f32 to vector<8x256xf32>
    %128 = arith.maximumf %126, %127 : vector<8x256xf32>
    %cst_39 = arith.constant dense<0.000000e+00> : vector<256xf32>
    %129 = vector.multi_reduction <add>, %128, %cst_39 [0] : vector<8x256xf32> to vector<256xf32>
    %130 = vector.shape_cast %129 : vector<256xf32> to vector<1x256xf32>
    %cst_40 = arith.constant 8.000000e+00 : f32
    %131 = vector.broadcast %cst_40 : f32 to vector<1x256xf32>
    %132 = arith.divf %130, %131 : vector<1x256xf32>
    %133 = vector.broadcast %132 : vector<1x256xf32> to vector<8x256xf32>
    %134 = arith.subf %128, %133 : vector<8x256xf32>
    %135 = arith.mulf %134, %134 : vector<8x256xf32>
    %cst_41 = arith.constant dense<0.000000e+00> : vector<256xf32>
    %136 = vector.multi_reduction <add>, %135, %cst_41 [0] : vector<8x256xf32> to vector<256xf32>
    %137 = vector.shape_cast %136 : vector<256xf32> to vector<1x256xf32>
    %cst_42 = arith.constant 8.000000e+00 : f32
    %138 = vector.broadcast %cst_42 : f32 to vector<1x256xf32>
    %139 = arith.divf %137, %138 : vector<1x256xf32>
    %140 = vector.broadcast %132 : vector<1x256xf32> to vector<8x256xf32>
    %141 = arith.subf %128, %140 : vector<8x256xf32>
    %cst_43 = arith.constant 9.99999974E-6 : f32
    %142 = vector.broadcast %cst_43 : f32 to vector<1x256xf32>
    %143 = arith.addf %139, %142 : vector<1x256xf32>
    %144 = math.rsqrt %143 : vector<1x256xf32>
    %145 = vector.broadcast %144 : vector<1x256xf32> to vector<8x256xf32>
    %146 = arith.mulf %141, %145 : vector<8x256xf32>
    %147 = vector.extract_strided_slice %116 {offsets = [2, 0], sizes = [1, 256], strides = [1, 1]} : vector<4x256xf32> to vector<1x256xf32>
    %148 = vector.broadcast %147 : vector<1x256xf32> to vector<8x256xf32>
    %149 = arith.mulf %146, %148 : vector<8x256xf32>
    %150 = vector.extract_strided_slice %116 {offsets = [3, 0], sizes = [1, 256], strides = [1, 1]} : vector<4x256xf32> to vector<1x256xf32>
    %151 = vector.broadcast %150 : vector<1x256xf32> to vector<8x256xf32>
    %152 = arith.addf %149, %151 : vector<8x256xf32>
    %153 = arith.truncf %152 : vector<8x256xf32> to vector<8x256xbf16>
    %c0_44 = arith.constant 0 : index
    %c0_45 = arith.constant 0 : index
    %154 = vector.load %arg10[%c0_44, %c0_45] : memref<4x128xf32, #tpu.memory_space<vmem>>, vector<4x128xf32>
    %c0_46 = arith.constant 0 : index
    %c0_47 = arith.constant 0 : index
    %155 = vector.load %arg9[%c0_46, %c0_47] : memref<256x128xi8, #tpu.memory_space<vmem>>, vector<256x128xi8>
    %156 = arith.sitofp %155 : vector<256x128xi8> to vector<256x128xf32>
    %157 = arith.truncf %156 : vector<256x128xf32> to vector<256x128xbf16>
    %cst_48 = arith.constant dense<0.000000e+00> : vector<8x128xf32>
    %158 = tpu.matmul %153, %157, %cst_48 {dimension_numbers = #tpu.dot_dimension_numbers<[1], [0], [0], [1], [0, 0, 1, 1], [], []>} : vector<8x256xbf16>, vector<256x128xbf16>, vector<8x128xf32> -> vector<8x128xf32>
    %159 = vector.extract_strided_slice %154 {offsets = [0, 0], sizes = [1, 128], strides = [1, 1]} : vector<4x128xf32> to vector<1x128xf32>
    %160 = vector.broadcast %159 : vector<1x128xf32> to vector<8x128xf32>
    %161 = arith.mulf %158, %160 : vector<8x128xf32>
    %162 = vector.extract_strided_slice %154 {offsets = [1, 0], sizes = [1, 128], strides = [1, 1]} : vector<4x128xf32> to vector<1x128xf32>
    %163 = vector.broadcast %162 : vector<1x128xf32> to vector<8x128xf32>
    %164 = arith.addf %161, %163 : vector<8x128xf32>
    %cst_49 = arith.constant 0.000000e+00 : f32
    %165 = vector.broadcast %cst_49 : f32 to vector<8x128xf32>
    %166 = arith.maximumf %164, %165 : vector<8x128xf32>
    %cst_50 = arith.constant dense<0.000000e+00> : vector<128xf32>
    %167 = vector.multi_reduction <add>, %166, %cst_50 [0] : vector<8x128xf32> to vector<128xf32>
    %168 = vector.shape_cast %167 : vector<128xf32> to vector<1x128xf32>
    %cst_51 = arith.constant 8.000000e+00 : f32
    %169 = vector.broadcast %cst_51 : f32 to vector<1x128xf32>
    %170 = arith.divf %168, %169 : vector<1x128xf32>
    %171 = vector.broadcast %170 : vector<1x128xf32> to vector<8x128xf32>
    %172 = arith.subf %166, %171 : vector<8x128xf32>
    %173 = arith.mulf %172, %172 : vector<8x128xf32>
    %cst_52 = arith.constant dense<0.000000e+00> : vector<128xf32>
    %174 = vector.multi_reduction <add>, %173, %cst_52 [0] : vector<8x128xf32> to vector<128xf32>
    %175 = vector.shape_cast %174 : vector<128xf32> to vector<1x128xf32>
    %cst_53 = arith.constant 8.000000e+00 : f32
    %176 = vector.broadcast %cst_53 : f32 to vector<1x128xf32>
    %177 = arith.divf %175, %176 : vector<1x128xf32>
    %178 = vector.broadcast %170 : vector<1x128xf32> to vector<8x128xf32>
    %179 = arith.subf %166, %178 : vector<8x128xf32>
    %cst_54 = arith.constant 9.99999974E-6 : f32
    %180 = vector.broadcast %cst_54 : f32 to vector<1x128xf32>
    %181 = arith.addf %177, %180 : vector<1x128xf32>
    %182 = math.rsqrt %181 : vector<1x128xf32>
    %183 = vector.broadcast %182 : vector<1x128xf32> to vector<8x128xf32>
    %184 = arith.mulf %179, %183 : vector<8x128xf32>
    %185 = vector.extract_strided_slice %154 {offsets = [2, 0], sizes = [1, 128], strides = [1, 1]} : vector<4x128xf32> to vector<1x128xf32>
    %186 = vector.broadcast %185 : vector<1x128xf32> to vector<8x128xf32>
    %187 = arith.mulf %184, %186 : vector<8x128xf32>
    %188 = vector.extract_strided_slice %154 {offsets = [3, 0], sizes = [1, 128], strides = [1, 1]} : vector<4x128xf32> to vector<1x128xf32>
    %189 = vector.broadcast %188 : vector<1x128xf32> to vector<8x128xf32>
    %190 = arith.addf %187, %189 : vector<8x128xf32>
    %191 = arith.truncf %190 : vector<8x128xf32> to vector<8x128xbf16>
    %c0_55 = arith.constant 0 : index
    %c0_56 = arith.constant 0 : index
    %192 = vector.load %arg12[%c0_55, %c0_56] : memref<4x128xf32, #tpu.memory_space<vmem>>, vector<4x128xf32>
    %c0_57 = arith.constant 0 : index
    %c0_58 = arith.constant 0 : index
    %193 = vector.load %arg11[%c0_57, %c0_58] : memref<128x128xi8, #tpu.memory_space<vmem>>, vector<128x128xi8>
    %194 = arith.sitofp %193 : vector<128x128xi8> to vector<128x128xf32>
    %195 = arith.truncf %194 : vector<128x128xf32> to vector<128x128xbf16>
    %cst_59 = arith.constant dense<0.000000e+00> : vector<8x128xf32>
    %196 = tpu.matmul %191, %195, %cst_59 {dimension_numbers = #tpu.dot_dimension_numbers<[1], [0], [0], [1], [0, 0, 1, 1], [], []>} : vector<8x128xbf16>, vector<128x128xbf16>, vector<8x128xf32> -> vector<8x128xf32>
    %197 = vector.extract_strided_slice %192 {offsets = [0, 0], sizes = [1, 128], strides = [1, 1]} : vector<4x128xf32> to vector<1x128xf32>
    %198 = vector.broadcast %197 : vector<1x128xf32> to vector<8x128xf32>
    %199 = arith.mulf %196, %198 : vector<8x128xf32>
    %200 = vector.extract_strided_slice %192 {offsets = [1, 0], sizes = [1, 128], strides = [1, 1]} : vector<4x128xf32> to vector<1x128xf32>
    %201 = vector.broadcast %200 : vector<1x128xf32> to vector<8x128xf32>
    %202 = arith.addf %199, %201 : vector<8x128xf32>
    %cst_60 = arith.constant 0.000000e+00 : f32
    %203 = vector.broadcast %cst_60 : f32 to vector<8x128xf32>
    %204 = arith.maximumf %202, %203 : vector<8x128xf32>
    %cst_61 = arith.constant dense<0.000000e+00> : vector<128xf32>
    %205 = vector.multi_reduction <add>, %204, %cst_61 [0] : vector<8x128xf32> to vector<128xf32>
    %206 = vector.shape_cast %205 : vector<128xf32> to vector<1x128xf32>
    %cst_62 = arith.constant 8.000000e+00 : f32
    %207 = vector.broadcast %cst_62 : f32 to vector<1x128xf32>
    %208 = arith.divf %206, %207 : vector<1x128xf32>
    %209 = vector.broadcast %208 : vector<1x128xf32> to vector<8x128xf32>
    %210 = arith.subf %204, %209 : vector<8x128xf32>
    %211 = arith.mulf %210, %210 : vector<8x128xf32>
    %cst_63 = arith.constant dense<0.000000e+00> : vector<128xf32>
    %212 = vector.multi_reduction <add>, %211, %cst_63 [0] : vector<8x128xf32> to vector<128xf32>
    %213 = vector.shape_cast %212 : vector<128xf32> to vector<1x128xf32>
    %cst_64 = arith.constant 8.000000e+00 : f32
    %214 = vector.broadcast %cst_64 : f32 to vector<1x128xf32>
    %215 = arith.divf %213, %214 : vector<1x128xf32>
    %216 = vector.broadcast %208 : vector<1x128xf32> to vector<8x128xf32>
    %217 = arith.subf %204, %216 : vector<8x128xf32>
    %cst_65 = arith.constant 9.99999974E-6 : f32
    %218 = vector.broadcast %cst_65 : f32 to vector<1x128xf32>
    %219 = arith.addf %215, %218 : vector<1x128xf32>
    %220 = math.rsqrt %219 : vector<1x128xf32>
    %221 = vector.broadcast %220 : vector<1x128xf32> to vector<8x128xf32>
    %222 = arith.mulf %217, %221 : vector<8x128xf32>
    %223 = vector.extract_strided_slice %192 {offsets = [2, 0], sizes = [1, 128], strides = [1, 1]} : vector<4x128xf32> to vector<1x128xf32>
    %224 = vector.broadcast %223 : vector<1x128xf32> to vector<8x128xf32>
    %225 = arith.mulf %222, %224 : vector<8x128xf32>
    %226 = vector.extract_strided_slice %192 {offsets = [3, 0], sizes = [1, 128], strides = [1, 1]} : vector<4x128xf32> to vector<1x128xf32>
    %227 = vector.broadcast %226 : vector<1x128xf32> to vector<8x128xf32>
    %228 = arith.addf %225, %227 : vector<8x128xf32>
    %229 = arith.truncf %228 : vector<8x128xf32> to vector<8x128xbf16>
    %c0_66 = arith.constant 0 : index
    %c0_67 = arith.constant 0 : index
    %230 = vector.load %arg14[%c0_66, %c0_67] : memref<2x768xf32, #tpu.memory_space<vmem>>, vector<2x768xf32>
    %c0_68 = arith.constant 0 : index
    %c0_69 = arith.constant 0 : index
    %231 = vector.load %arg13[%c0_68, %c0_69] : memref<128x768xi8, #tpu.memory_space<vmem>>, vector<128x768xi8>
    %232 = arith.sitofp %231 : vector<128x768xi8> to vector<128x768xf32>
    %233 = arith.truncf %232 : vector<128x768xf32> to vector<128x768xbf16>
    %cst_70 = arith.constant dense<0.000000e+00> : vector<8x768xf32>
    %234 = tpu.matmul %229, %233, %cst_70 {dimension_numbers = #tpu.dot_dimension_numbers<[1], [0], [0], [1], [0, 0, 1, 1], [], []>} : vector<8x128xbf16>, vector<128x768xbf16>, vector<8x768xf32> -> vector<8x768xf32>
    %235 = vector.extract_strided_slice %230 {offsets = [0, 0], sizes = [1, 768], strides = [1, 1]} : vector<2x768xf32> to vector<1x768xf32>
    %236 = vector.broadcast %235 : vector<1x768xf32> to vector<8x768xf32>
    %237 = arith.mulf %234, %236 : vector<8x768xf32>
    %238 = vector.extract_strided_slice %230 {offsets = [1, 0], sizes = [1, 768], strides = [1, 1]} : vector<2x768xf32> to vector<1x768xf32>
    %239 = vector.broadcast %238 : vector<1x768xf32> to vector<8x768xf32>
    %240 = arith.addf %237, %239 : vector<8x768xf32>
    %241 = math.tanh %240 : vector<8x768xf32>
    %c0_71 = arith.constant 0 : index
    %c0_72 = arith.constant 0 : index
    %242 = vector.load %arg15[%c0_71, %c0_72] : memref<8x768xf32, #tpu.memory_space<vmem>>, vector<8x768xf32>
    tpu.vector_store %arg15[%c0_71, %c0_72], %241 {strides = array<i32>} : memref<8x768xf32, #tpu.memory_space<vmem>>, vector<8x768xf32>,
    return
  }
}

</mosaic_0001>

<bundles_post_ra>
// kernel: generator_forward.1
= control target key start
LH: loop header
LB: loop body
LE: loop exit
PB: predicated region body
PF: predicated region fallthrough
CT: control target
= control target key end

     0   :  { %20 = vsyncpa [#allocation3], 0  ;;  %s2326_s0 = inlined_call_operand.vmem [shape: f32[8,64], index: 0, kind: input, shape index: {}]   ;;  %s2327_s1 = inlined_call_operand.hbm [shape: s8[64,128], index: 1, kind: input, shape index: {}]   ;;  %s2328_s2 = inlined_call_operand.hbm [shape: f32[4,128], index: 2, kind: input, shape index: {}]   ;;  %s2329_s3 = inlined_call_operand.hbm [shape: s8[128,256], index: 3, kind: input, shape index: {}]   ;;  %s2330_s4 = inlined_call_operand.hbm [shape: f32[4,256], index: 4, kind: input, shape index: {}]   ;;  %s2331_s5 = inlined_call_operand.hbm [shape: s8[256,256], index: 5, kind: input, shape index: {}]   ;;  %s2332_s6 = inlined_call_operand.hbm [shape: f32[4,256], index: 6, kind: input, shape index: {}]   ;;  %s2333_s7 = inlined_call_operand.hbm [shape: s8[256,256], index: 7, kind: input, shape index: {}]   ;;  %s2334_s8 = inlined_call_operand.hbm [shape: f32[4,256], index: 8, kind: input, shape index: {}]   ;;  %s2335_s9 = inlined_call_operand.hbm [shape: s8[256,128], index: 9, kind: input, shape index: {}]   ;;  %s2336_s10 = inlined_call_operand.hbm [shape: f32[4,128], index: 10, kind: input, shape index: {}]   ;;  %s2337_s11 = inlined_call_operand.vmem [shape: s8[128,128], index: 11, kind: input, shape index: {}]   ;;  %s2338_s12 = inlined_call_operand.hbm [shape: f32[4,128], index: 12, kind: input, shape index: {}]   ;;  %s2339_s13 = inlined_call_operand.hbm [shape: s8[128,768], index: 13, kind: input, shape index: {}]   ;;  %s2340_s14 = inlined_call_operand.vmem [shape: f32[2,768], index: 14, kind: input, shape index: {}]   ;;  %s2341_s15 = inlined_call_operand.vmem [shape: f32[8,768], index: 15, kind: output, shape index: {}]  }
   0x1   :  { %21 = vsyncpa [#allocation5], 0 }
   0x2   :  { %22 = vsyncpa [#allocation8], 0 }
   0x3   :  { %23 = vsyncpa [#allocation11], 0 }
   0x4   :  { %24 = vsyncpa [#allocation14], 0 }
   0x5   :  { %25 = vsyncpa [#allocation17], 0 }
   0x6   :  { %26 = vsyncpa [#allocation20], 0  ;;  %s1852_s18 = smov [#allocation4]   ;;  %s1853_s20 = smov [#allocation7]  }
   0x7   :  { %s47_s19 = sshll.u32 %s1852_s18, 4  ;;  %s69_s21 = sshll.u32 %s1853_s20, 4  ;;  %s48_s19 = int_to_ptr.vmem [resolvable:$true] %s47_s19  ;;  %s70_s21 = int_to_ptr.vmem [resolvable:$true] %s69_s21 }
   0x8   :  { %s1574_s24 = scalar_lea.hbm %s2328_s2, 64 }
   0x9   :  { %p1575_p0 = scmp.ne.s32.totalorder %s2328_s2, %s1574_s24  ;;  %p1578_p1 = scmp.lt.u32.totalorder %s1574_s24, %s2328_s2 }
   0xb   :  { %p1580_p2 = pnand %p1578_p1, %p1575_p0 }
   0xd   :  { %1583 = shalt.err (!%p1580_p2)
}
   0xe   :  { %s1584_s29 = scalar_lea.vmem %s48_s19, 64  ;;  %p1589_p4 = scmp.lt.s32.totalorder %s48_s19, %s48_s19 }
   0xf   :  { %p1585_p3 = scmp.ne.s32.totalorder %s48_s19, %s1584_s29  ;;  %p1590_p5 = scmp.lt.s32.totalorder %s1584_s29, %s1584_s29 }
  0x11   :  { %p1591_p6 = por %p1590_p5, %p1589_p4 }
  0x13   :  { %p1592_p7 = pnand %p1591_p6, %p1585_p3 }
  0x15   :  { %1595 = shalt.err (!%p1592_p7)
}
  0x16   :  { %50 = dma.hbm_to_vmem [thread:$0]  %s2328_s2, 64, %s48_s19, [#allocation5]  }
  0x17   :  { %s1596_s20 = scalar_lea.hbm %s2330_s4, 128 }
  0x18   :  { %p1597_p8 = scmp.ne.s32.totalorder %s2330_s4, %s1596_s20  ;;  %p1600_p9 = scmp.lt.u32.totalorder %s1596_s20, %s2330_s4 }
  0x1a   :  { %p1602_p10 = pnand %p1600_p9, %p1597_p8 }
  0x1c   :  { %1605 = shalt.err (!%p1602_p10)
}
  0x1d   :  { %s1606_s26 = scalar_lea.vmem %s70_s21, 128  ;;  %p1611_p12 = scmp.lt.s32.totalorder %s70_s21, %s70_s21 }
  0x1e   :  { %p1607_p11 = scmp.ne.s32.totalorder %s70_s21, %s1606_s26  ;;  %p1612_p13 = scmp.lt.s32.totalorder %s1606_s26, %s1606_s26 }
  0x20   :  { %p1613_p0 = por %p1612_p13, %p1611_p12 }
  0x22   :  { %p1614_p1 = pnand %p1613_p0, %p1607_p11 }
  0x24   :  { %1617 = shalt.err (!%p1614_p1)
}
  0x25   :  { %72 = dma.hbm_to_vmem [thread:$0]  %s2330_s4, 128, %s70_s21, [#allocation8]  }
  0x26   :  { %s1854_s27 = smov [#allocation10]   ;;  %s1855_s29 = smov [#allocation13]  }
  0x27   :  { %s91_s28 = sshll.u32 %s1854_s27, 4  ;;  %s113_s30 = sshll.u32 %s1855_s29, 4  ;;  %s92_s28 = int_to_ptr.vmem [resolvable:$true] %s91_s28  ;;  %s114_s30 = int_to_ptr.vmem [resolvable:$true] %s113_s30 }
  0x28   :  { %s1618_s18 = scalar_lea.hbm %s2332_s6, 128 }
  0x29   :  { %p1619_p2 = scmp.ne.s32.totalorder %s2332_s6, %s1618_s18  ;;  %p1622_p3 = scmp.lt.u32.totalorder %s1618_s18, %s2332_s6 }
  0x2b   :  { %p1624_p4 = pnand %p1622_p3, %p1619_p2 }
  0x2d   :  { %1627 = shalt.err (!%p1624_p4)
}
  0x2e   :  { %s1628_s4 = scalar_lea.vmem %s92_s28, 128  ;;  %p1633_p6 = scmp.lt.s32.totalorder %s92_s28, %s92_s28 }
  0x2f   :  { %p1629_p5 = scmp.ne.s32.totalorder %s92_s28, %s1628_s4  ;;  %p1634_p7 = scmp.lt.s32.totalorder %s1628_s4, %s1628_s4 }
  0x31   :  { %p1635_p8 = por %p1634_p7, %p1633_p6 }
  0x33   :  { %p1636_p9 = pnand %p1635_p8, %p1629_p5 }
  0x35   :  { %1639 = shalt.err (!%p1636_p9)
}
  0x36   :  { %94 = dma.hbm_to_vmem [thread:$0]  %s2332_s6, 128, %s92_s28, [#allocation11]  }
  0x37   :  { %s1640_s19 = scalar_lea.hbm %s2334_s8, 128 }
  0x38   :  { %p1641_p10 = scmp.ne.s32.totalorder %s2334_s8, %s1640_s19  ;;  %p1644_p11 = scmp.lt.u32.totalorder %s1640_s19, %s2334_s8 }
  0x3a   :  { %p1646_p12 = pnand %p1644_p11, %p1641_p10 }
  0x3c   :  { %1649 = shalt.err (!%p1646_p12)
}
  0x3d   :  { %s1650_s18 = scalar_lea.vmem %s114_s30, 128  ;;  %p1655_p0 = scmp.lt.s32.totalorder %s114_s30, %s114_s30 }
  0x3e   :  { %p1651_p13 = scmp.ne.s32.totalorder %s114_s30, %s1650_s18  ;;  %p1656_p1 = scmp.lt.s32.totalorder %s1650_s18, %s1650_s18 }
  0x40   :  { %p1657_p2 = por %p1656_p1, %p1655_p0 }
  0x42   :  { %p1658_p3 = pnand %p1657_p2, %p1651_p13 }
  0x44   :  { %1661 = shalt.err (!%p1658_p3)
}
  0x45   :  { %116 = dma.hbm_to_vmem [thread:$0]  %s2334_s8, 128, %s114_s30, [#allocation14]  }
  0x46   :  { %s1856_s20 = smov [#allocation16]   ;;  %s1857_s23 = smov [#allocation2]  }
  0x47   :  { %s135_s22 = sshll.u32 %s1856_s20, 4  ;;  %s34_s24 = sshll.u32 %s1857_s23, 4  ;;  %s136_s22 = int_to_ptr.vmem [resolvable:$true] %s135_s22  ;;  %s2001_s24 = int_to_ptr.vmem [resolvable:$true] %s34_s24 }
  0x48   :  { %s1662_s25 = scalar_lea.hbm %s2336_s10, 64 }
  0x49   :  { %p1663_p4 = scmp.ne.s32.totalorder %s2336_s10, %s1662_s25  ;;  %p1666_p5 = scmp.lt.u32.totalorder %s1662_s25, %s2336_s10 }
  0x4b   :  { %p1668_p6 = pnand %p1666_p5, %p1663_p4 }
  0x4d   :  { %1671 = shalt.err (!%p1668_p6)
}
  0x4e   :  { %s1672_s8 = scalar_lea.vmem %s136_s22, 64  ;;  %p1677_p8 = scmp.lt.s32.totalorder %s136_s22, %s136_s22 }
  0x4f   :  { %p1673_p7 = scmp.ne.s32.totalorder %s136_s22, %s1672_s8  ;;  %p1678_p9 = scmp.lt.s32.totalorder %s1672_s8, %s1672_s8 }
  0x51   :  { %p1679_p10 = por %p1678_p9, %p1677_p8 }
  0x53   :  { %p1680_p11 = pnand %p1679_p10, %p1673_p7 }
  0x55   :  { %1683 = shalt.err (!%p1680_p11)
}
  0x56   :  { %138 = dma.hbm_to_vmem [thread:$0]  %s2336_s10, 64, %s136_s22, [#allocation17]  }
  0x57   :  { %s1684_s18 = scalar_lea.hbm %s2327_s1, 256 }
  0x58   :  { %p1685_p12 = scmp.ne.s32.totalorder %s2327_s1, %s1684_s18  ;;  %p1688_p13 = scmp.lt.u32.totalorder %s1684_s18, %s2327_s1 }
  0x5a   :  { %p1690_p0 = pnand %p1688_p13, %p1685_p12 }
  0x5c   :  { %1693 = shalt.err (!%p1690_p0)
}
  0x5d   :  { %s1694_s4 = scalar_lea.vmem %s2001_s24, 256  ;;  %p1699_p2 = scmp.lt.s32.totalorder %s2001_s24, %s2001_s24 }
  0x5e   :  { %p1695_p1 = scmp.ne.s32.totalorder %s2001_s24, %s1694_s4  ;;  %p1700_p3 = scmp.lt.s32.totalorder %s1694_s4, %s1694_s4 }
  0x60   :  { %p1701_p4 = por %p1700_p3, %p1699_p2 }
  0x62   :  { %p1702_p5 = pnand %p1701_p4, %p1695_p1 }
  0x64   :  { %1705 = shalt.err (!%p1702_p5)
}
  0x65   :  { %s1858_s10 = smov 128   ;;  %s1859_s22 = smov 8  }
  0x66   :  { %40 = dma.hbm_to_vmem [thread:$0]  %s2327_s1, 256, %s2001_s24, [#allocation3], %s1858_s10, %s1858_s10, %s1859_s22  }
  0x67   :  { %s1860_s26 = smov [#allocation6]   ;;  %s1706_s8 = scalar_lea.hbm %s2329_s3, 1024 }
  0x68   :  { %s56_s2 = sshll.u32 %s1860_s26, 4  ;;  %p1707_p6 = scmp.ne.s32.totalorder %s2329_s3, %s1706_s8  ;;  %s57_s2 = int_to_ptr.vmem [resolvable:$true] %s56_s2 }
  0x69   :  { %p1710_p7 = scmp.lt.u32.totalorder %s1706_s8, %s2329_s3 }
  0x6b   :  { %p1712_p8 = pnand %p1710_p7, %p1707_p6 }
  0x6d   :  { %1715 = shalt.err (!%p1712_p8)
}
  0x6e   :  { %s1716_s18 = scalar_lea.vmem %s57_s2, 1024  ;;  %p1721_p10 = scmp.lt.s32.totalorder %s57_s2, %s57_s2 }
  0x6f   :  { %p1717_p9 = scmp.ne.s32.totalorder %s57_s2, %s1716_s18  ;;  %p1722_p11 = scmp.lt.s32.totalorder %s1716_s18, %s1716_s18 }
  0x71   :  { %p1723_p12 = por %p1722_p11, %p1721_p10 }
  0x73   :  { %p1724_p13 = pnand %p1723_p12, %p1717_p9 }
  0x75   :  { %1727 = shalt.err (!%p1724_p13)
}
  0x76   :  { %s1861_s1 = smov 256   ;;  %s1862_s24 = smov 16  }
  0x77   :  { %62 = dma.hbm_to_vmem [thread:$0]  %s2329_s3, 1024, %s57_s2, [#allocation5], %s1861_s1, %s1861_s1, %s1862_s24  }
  0x78   :  { %s1863_s20 = smov [#allocation9]   ;;  %s1864_s4 = smov [#allocation12]  }
  0x79   :  { %s78_s23 = sshll.u32 %s1863_s20, 4  ;;  %s100_s21 = sshll.u32 %s1864_s4, 4  ;;  %s79_s23 = int_to_ptr.vmem [resolvable:$true] %s78_s23  ;;  %s101_s21 = int_to_ptr.vmem [resolvable:$true] %s100_s21 }
  0x7a   :  { %s1728_s19 = scalar_lea.hbm %s2331_s5, 2048 }
  0x7b   :  { %p1729_p0 = scmp.ne.s32.totalorder %s2331_s5, %s1728_s19  ;;  %p1732_p1 = scmp.lt.u32.totalorder %s1728_s19, %s2331_s5 }
  0x7d   :  { %p1734_p2 = pnand %p1732_p1, %p1729_p0 }
  0x7f   :  { %1737 = shalt.err (!%p1734_p2)
}
  0x80   :  { %s1738_s3 = scalar_lea.vmem %s79_s23, 2048  ;;  %p1743_p4 = scmp.lt.s32.totalorder %s79_s23, %s79_s23 }
  0x81   :  { %p1739_p3 = scmp.ne.s32.totalorder %s79_s23, %s1738_s3  ;;  %p1744_p5 = scmp.lt.s32.totalorder %s1738_s3, %s1738_s3 }
  0x83   :  { %p1745_p6 = por %p1744_p5, %p1743_p4 }
  0x85   :  { %p1746_p7 = pnand %p1745_p6, %p1739_p3 }
  0x87   :  { %1749 = shalt.err (!%p1746_p7)
}
  0x88   :  { %84 = dma.hbm_to_vmem [thread:$0]  %s2331_s5, 2048, %s79_s23, [#allocation8], %s1861_s1, %s1861_s1, %s1862_s24  }
  0x89   :  { %s1750_s6 = scalar_lea.hbm %s2333_s7, 2048 }
  0x8a   :  { %p1751_p8 = scmp.ne.s32.totalorder %s2333_s7, %s1750_s6  ;;  %p1754_p9 = scmp.lt.u32.totalorder %s1750_s6, %s2333_s7 }
  0x8c   :  { %p1756_p10 = pnand %p1754_p9, %p1751_p8 }
  0x8e   :  { %1759 = shalt.err (!%p1756_p10)
}
  0x8f   :  { %s1760_s26 = scalar_lea.vmem %s101_s21, 2048  ;;  %p1765_p12 = scmp.lt.s32.totalorder %s101_s21, %s101_s21 }
  0x90   :  { %p1761_p11 = scmp.ne.s32.totalorder %s101_s21, %s1760_s26  ;;  %p1766_p13 = scmp.lt.s32.totalorder %s1760_s26, %s1760_s26 }
  0x92   :  { %p1767_p0 = por %p1766_p13, %p1765_p12 }
  0x94   :  { %p1768_p1 = pnand %p1767_p0, %p1761_p11 }
  0x96   :  { %1771 = shalt.err (!%p1768_p1)
}
  0x97   :  { %106 = dma.hbm_to_vmem [thread:$0]  %s2333_s7, 2048, %s101_s21, [#allocation11], %s1861_s1, %s1861_s1, %s1862_s24  }
  0x98   :  { %s1865_s19 = smov [#allocation15]   ;;  %s1866_s8 = smov [#allocation18]  }
  0x99   :  { %s122_s27 = sshll.u32 %s1865_s19, 4  ;;  %s147_s30 = sshll.u32 %s1866_s8, 4  ;;  %s123_s27 = int_to_ptr.vmem [resolvable:$true] %s122_s27  ;;  %s148_s30 = int_to_ptr.vmem [resolvable:$true] %s147_s30 }
  0x9a   :  { %s1772_s2 = scalar_lea.hbm %s2335_s9, 1024 }
  0x9b   :  { %p1773_p2 = scmp.ne.s32.totalorder %s2335_s9, %s1772_s2  ;;  %p1776_p3 = scmp.lt.u32.totalorder %s1772_s2, %s2335_s9 }
  0x9d   :  { %p1778_p4 = pnand %p1776_p3, %p1773_p2 }
  0x9f   :  { %1781 = shalt.err (!%p1778_p4)
}
  0xa0   :  { %s1782_s7 = scalar_lea.vmem %s123_s27, 1024  ;;  %p1787_p6 = scmp.lt.s32.totalorder %s123_s27, %s123_s27 }
  0xa1   :  { %p1783_p5 = scmp.ne.s32.totalorder %s123_s27, %s1782_s7  ;;  %p1788_p7 = scmp.lt.s32.totalorder %s1782_s7, %s1782_s7 }
  0xa3   :  { %p1789_p8 = por %p1788_p7, %p1787_p6 }
  0xa5   :  { %p1790_p9 = pnand %p1789_p8, %p1783_p5 }
  0xa7   :  { %1793 = shalt.err (!%p1790_p9)
}
  0xa8   :  { %128 = dma.hbm_to_vmem [thread:$0]  %s2335_s9, 1024, %s123_s27, [#allocation14], %s1858_s10, %s1858_s10, %s1859_s22  }
  0xa9   :  { %s1794_s20 = scalar_lea.hbm %s2338_s12, 64 }
  0xaa   :  { %p1795_p10 = scmp.ne.s32.totalorder %s2338_s12, %s1794_s20  ;;  %p1798_p11 = scmp.lt.u32.totalorder %s1794_s20, %s2338_s12 }
  0xac   :  { %p1800_p12 = pnand %p1798_p11, %p1795_p10 }
  0xae   :  { %1803 = shalt.err (!%p1800_p12)
}
  0xaf   :  { %s1804_s23 = scalar_lea.vmem %s148_s30, 64  ;;  %p1809_p0 = scmp.lt.s32.totalorder %s148_s30, %s148_s30 }
  0xb0   :  { %p1805_p13 = scmp.ne.s32.totalorder %s148_s30, %s1804_s23  ;;  %p1810_p1 = scmp.lt.s32.totalorder %s1804_s23, %s1804_s23 }
  0xb2   :  { %p1811_p2 = por %p1810_p1, %p1809_p0 }
  0xb4   :  { %p1812_p3 = pnand %p1811_p2, %p1805_p13 }
  0xb6   :  { %1815 = shalt.err (!%p1812_p3)
}
  0xb7   :  { %150 = dma.hbm_to_vmem [thread:$0]  %s2338_s12, 64, %s148_s30, [#allocation17]  }
  0xb8   :  { %s1867_s22 = smov [#allocation19]   ;;  %s1816_s29 = scalar_lea.hbm %s2339_s13, 3072 }
  0xb9   :  { %s156_s19 = sshll.u32 %s1867_s22, 4  ;;  %p1817_p4 = scmp.ne.s32.totalorder %s2339_s13, %s1816_s29  ;;  %s157_s19 = int_to_ptr.vmem [resolvable:$true] %s156_s19 }
  0xba   :  { %p1820_p5 = scmp.lt.u32.totalorder %s1816_s29, %s2339_s13 }
  0xbc   :  { %p1822_p6 = pnand %p1820_p5, %p1817_p4 }
  0xbe   :  { %1825 = shalt.err (!%p1822_p6)
}
  0xbf   :  { %s1826_s18 = scalar_lea.vmem %s157_s19, 3072  ;;  %p1831_p8 = scmp.lt.s32.totalorder %s157_s19, %s157_s19 }
  0xc0   :  { %p1827_p7 = scmp.ne.s32.totalorder %s157_s19, %s1826_s18  ;;  %p1832_p9 = scmp.lt.s32.totalorder %s1826_s18, %s1826_s18 }
  0xc2   :  { %p1833_p10 = por %p1832_p9, %p1831_p8 }
  0xc4   :  { %p1834_p11 = pnand %p1833_p10, %p1827_p7 }
  0xc6   :  { %1837 = shalt.err (!%p1834_p11)
}
  0xc7   :  { %s1868_s12 = smov 768   ;;  %s1869_s30 = smov 48  }
  0xc8   :  { %162 = dma.hbm_to_vmem [thread:$0]  %s2339_s13, 3072, %s157_s19, [#allocation20], %s1868_s12, %s1868_s12, %s1869_s30  }
  0xc9   :  { %1838 = dma.done.wait [#allocation3], 256  }
  0xca   :  { %1839 = vsyncadd [#allocation3], 4294967040 }
  0xcb   :  { %1840 = dma.done.wait [#allocation5], 1088  }
  0xcc   :  { %1841 = vsyncadd [#allocation5], 4294966208 }
  0xcd   :  { %1842 = dma.done.wait [#allocation8], 2176  }
  0xce   :  { %1843 = vsyncadd [#allocation8], 4294965120 }
  0xcf   :  { %1844 = dma.done.wait [#allocation11], 2176  }
  0xd0   :  { %1845 = vsyncadd [#allocation11], 4294965120 }
  0xd1   :  { %1846 = dma.done.wait [#allocation14], 1152  }
  0xd2   :  { %1847 = vsyncadd [#allocation14], 4294966144 }
  0xd3   :  { %1848 = dma.done.wait [#allocation17], 128  }
  0xd4   :  { %1849 = vsyncadd [#allocation17], 4294967168 }
  0xd5   :  { %1850 = dma.done.wait [#allocation20], 3072  }
  0xd6   :  { %1851 = vsyncadd [#allocation20], 4294964224  ;;  %v1870_v0 = vmov 0.0   ;;  %vm1871_vm0 = vmmov 0   ;;  %v205_v1 = vld [vmem:[#allocation2] sm:$0xff]  ;;  %v206_v4 = vld [vmem:[#allocation2 + $0x8] sm:$0xff]  ;;  %v255_v38 = vlaneseq }
  0xd7   :  { %1491 = vmatprep.subr.bf16.mxu0 %v1870_v0  ;;  %1499 = vmatprep.mubr.msk.bf16.mxu0 %vm1871_vm0, %v1870_v0  ;;  %v207_v2 = vunpack.c.l.s8.bf16 %v205_v1  ;;  %v208_v3 = vunpack.c.h.s8.bf16 %v205_v1  ;;  %v209_v5 = vunpack.c.l.s8.bf16 %v206_v4  ;;  %v210_v6 = vunpack.c.h.s8.bf16 %v206_v4  ;;  %v202_v7 = vld [vmem:[%s2326_s0] sm:$0xff]  ;;  %v299_v9 = vld [vmem:[#allocation6 + $0x8] sm:$0xff]  ;;  %v298_v11 = vld [vmem:[#allocation6] sm:$0xff] }
  0xd8   :  { %v203_v8 = vpack.c.bf16 %v202_v7, %v202_v7  ;;  %vm211_vm1 = vcmask 523264   ;;  %v307_v10 = vunpack.c.l.s8.bf16 %v299_v9  ;;  %v306_v12 = vunpack.c.l.s8.bf16 %v298_v11  ;;  %v301_v15 = vld [vmem:[#allocation6 + $0x18] sm:$0xff]  ;;  %v300_v17 = vld [vmem:[#allocation6 + $0x10] sm:$0xff]  ;;  %v303_v21 = vld [vmem:[#allocation6 + $0x28] sm:$0xff] }
  0xd9   :  { %1492 = vmatpush3.bf16.msra.mxu0 %v207_v2  ;;  %v309_v13 = vunpack.c.h.s8.bf16 %v299_v9  ;;  %v308_v14 = vunpack.c.h.s8.bf16 %v298_v11  ;;  %v311_v16 = vunpack.c.l.s8.bf16 %v301_v15  ;;  %v310_v18 = vunpack.c.l.s8.bf16 %v300_v17  ;;  %v302_v22 = vld [vmem:[#allocation6 + $0x20] sm:$0xff]  ;;  %v305_v27 = vld [vmem:[#allocation6 + $0x38] sm:$0xff]  ;;  %v304_v30 = vld [vmem:[#allocation6 + $0x30] sm:$0xff] }
  0xda   :  { %1493 = vmatprep.subr.bf16.mxu0 %v1870_v0  ;;  %322 = vmatprep.subr.bf16.mxu1 %v307_v10  ;;  %v313_v19 = vunpack.c.h.s8.bf16 %v301_v15  ;;  %v312_v20 = vunpack.c.h.s8.bf16 %v300_v17  ;;  %v315_v23 = vunpack.c.l.s8.bf16 %v303_v21  ;;  %v314_v24 = vunpack.c.l.s8.bf16 %v302_v22  ;;  %v488_v34 = vld [vmem:[#allocation9 + $0x8] sm:$0xff]  ;;  %v487_v35 = vld [vmem:[#allocation9] sm:$0xff]  ;;  %v204_v41 = vld [vmem:[#allocation4] sm:$0xf] }
  0xdb   :  { %323 = vmatpush1.bf16.msra.mxu1 %v306_v12  ;;  %v317_v25 = vunpack.c.h.s8.bf16 %v303_v21  ;;  %v1872_v26 = vmov 0   ;;  %v316_v28 = vunpack.c.h.s8.bf16 %v302_v22  ;;  %v319_v29 = vunpack.c.l.s8.bf16 %v305_v27  ;;  %v490_v17 = vld [vmem:[#allocation9 + $0x18] sm:$0xff] }
  0xdc   :  { %324 = vmatprep.subr.bf16.mxu1 %v309_v13  ;;  %354 = vmatprep.mubr.bf16.mxu1 %v1872_v26  ;;  %v318_v31 = vunpack.c.l.s8.bf16 %v304_v30  ;;  %v321_v32 = vunpack.c.h.s8.bf16 %v305_v27  ;;  %v320_v33 = vunpack.c.h.s8.bf16 %v304_v30  ;;  %v504_v36 = vunpack.c.l.s8.bf16 %v488_v34  ;;  %v494_v30 = vld [vmem:[#allocation9 + $0x38] sm:$0xff] }
  0xdd   :  { %1494 = vmatpush3.bf16.msra.mxu0 %v208_v3  ;;  %v503_v37 = vunpack.c.l.s8.bf16 %v487_v35  ;;  %v2129_v39 = vshrl.u32 %v255_v38, 7  ;;  %v506_v15 = vunpack.c.h.s8.bf16 %v488_v34  ;;  %v510_v21 = vunpack.c.h.s8.bf16 %v490_v17  ;;  %v495_v38 = vld [vmem:[#allocation9 + $0x40] sm:$0xff] }
  0xde   :  { %1495 = vmatprep.subr.bf16.mxu0 %v1870_v0  ;;  %v518_v34 = vunpack.c.h.s8.bf16 %v494_v30 }
  0xdf   :  { %325 = vmatpush1.bf16.msra.mxu1 %v308_v14  ;;  %v2132_v40 = vsub.s32 0, %v2129_v39  ;;  %v2135_v42 = vsub.s32 1, %v2129_v39  ;;  %v2143_v7 = vsub.s32 3, %v2129_v39 }
  0xe0   :  { %326 = vmatprep.subr.bf16.mxu1 %v311_v16  ;;  %v505_v16 = vunpack.c.h.s8.bf16 %v487_v35 }
  0xe1   :  { %1496 = vmatpush3.bf16.msra.mxu0 %v209_v5  ;;  %v258_v43 = vrot.slane %v204_v41, %v2132_v40  ;;  %v263_v44 = vrot.slane %v204_v41, %v2135_v42  ;;  %v294_v11 = vrot.slane %v204_v41, %v2143_v7 }
  0xe2   :  { %1497 = vmatprep.subr.bf16.mxu0 %v1870_v0 }
  0xe3   :  { %327 = vmatpush1.bf16.msra.mxu1 %v310_v18  ;;  %v508_v18 = vunpack.c.l.s8.bf16 %v490_v17 }
  0xe4   :  { %328 = vmatprep.subr.bf16.mxu1 %v313_v19  ;;  %v489_v19 = vld [vmem:[#allocation9 + $0x10] sm:$0xff] }
  0xe5   :  { %1498 = vmatpush3.bf16.msra.mxu0 %v210_v6  ;;  %v2140_v6 = vsub.s32 2, %v2129_v39  ;;  %v509_v22 = vunpack.c.h.s8.bf16 %v489_v19 }
  0xe6   :  { %535 = vmatprep.subr.bf16.mxu0 %v504_v36  ;;  %v496_v36 = vld [vmem:[#allocation9 + $0x48] sm:$0xff] }
  0xe7   :  { %329 = vmatpush1.bf16.msra.mxu1 %v312_v20  ;;  %v507_v20 = vunpack.c.l.s8.bf16 %v489_v19 }
  0xe8   :  { %1500 = vmatmul.mubr.msk.bf16.vlgmr.msra.gmra.mrb[0].mxu0 %vm211_vm1, %v203_v8  ;;  %330 = vmatprep.subr.bf16.mxu1 %v315_v23  ;;  %v289_v8 = vrot.slane %v204_v41, %v2140_v6  ;;  %v492_v23 = vld [vmem:[#allocation9 + $0x28] sm:$0xff]  ;;  %v519_v41 = vunpack.c.l.s8.bf16 %v495_v38 }
  0xe9   :  { %536 = vmatpush1.bf16.msra.mxu0 %v503_v37  ;;  %v520_v37 = vunpack.c.l.s8.bf16 %v496_v36 }
  0xea   :  { %537 = vmatprep.subr.bf16.mxu0 %v506_v15 }
  0xeb   :  { %331 = vmatpush1.bf16.msra.mxu1 %v314_v24  ;;  %v512_v24 = vunpack.c.l.s8.bf16 %v492_v23 }
  0xec   :  { %332 = vmatprep.subr.bf16.mxu1 %v317_v25  ;;  %v491_v25 = vld [vmem:[#allocation9 + $0x20] sm:$0xff] }
  0xed   :  { %538 = vmatpush1.bf16.msra.mxu0 %v505_v16  ;;  %v511_v27 = vunpack.c.l.s8.bf16 %v491_v25 }
  0xee   :  { %539 = vmatprep.subr.bf16.mxu0 %v508_v18 }
  0xef   :  { %333 = vmatpush1.bf16.msra.mxu1 %v316_v28  ;;  %v514_v28 = vunpack.c.h.s8.bf16 %v492_v23 }
  0xf0   :  { %334 = vmatprep.subr.bf16.mxu1 %v319_v29  ;;  %v513_v29 = vunpack.c.h.s8.bf16 %v491_v25 }
  0xf1   :  { %540 = vmatpush1.bf16.msra.mxu0 %v507_v20 }
  0xf2   :  { %541 = vmatprep.subr.bf16.mxu0 %v510_v21 }
  0xf3   :  { %335 = vmatpush1.bf16.msra.mxu1 %v318_v31  ;;  %v516_v31 = vunpack.c.l.s8.bf16 %v494_v30 }
  0xf4   :  { %336 = vmatprep.subr.bf16.mxu1 %v321_v32  ;;  %v493_v32 = vld [vmem:[#allocation9 + $0x30] sm:$0xff] }
  0xf5   :  { %542 = vmatpush1.bf16.msra.mxu0 %v509_v22  ;;  %v517_v35 = vunpack.c.h.s8.bf16 %v493_v32 }
  0xf6   :  { %543 = vmatprep.subr.bf16.mxu0 %v512_v24 }
  0xf7   :  { %337 = vmatpush1.bf16.msra.mxu1 %v320_v33  ;;  %v515_v33 = vunpack.c.l.s8.bf16 %v493_v32 }
  0xf9   :  { %544 = vmatpush1.bf16.msra.mxu0 %v511_v27 }
  0xfa   :  { %545 = vmatprep.subr.bf16.mxu0 %v514_v28 }
  0xfd   :  { %546 = vmatpush1.bf16.msra.mxu0 %v513_v29 }
  0xfe   :  { %547 = vmatprep.subr.bf16.mxu0 %v516_v31 }
 0x101   :  { %548 = vmatpush1.bf16.msra.mxu0 %v515_v33 }
 0x102   :  { %549 = vmatprep.subr.bf16.mxu0 %v518_v34 }
 0x105   :  { %550 = vmatpush1.bf16.msra.mxu0 %v517_v35 }
 0x106   :  { %551 = vmatprep.subr.bf16.mxu0 %v520_v37 }
 0x109   :  { %552 = vmatpush1.bf16.msra.mxu0 %v519_v41 }
 0x1bb   :  { %v249_v45 = vpop.f32.mrb[0].mxu0 }
 0x1bc   :  { %v259_v46 = vmul.f32 %v258_v43, %v249_v45  ;;  %v1501_v47 = vpop.f32.mrb[1].mxu0  ;;  %v522_v43 = vunpack.c.h.s8.bf16 %v496_v36  ;;  %v498_v45 = vld [vmem:[#allocation9 + $0x58] sm:$0xff] }
 0x1bd   :  { %v252_v48 = vpop.f32.mrb[2].mxu0  ;;  %v497_v47 = vld [vmem:[#allocation9 + $0x50] sm:$0xff] }
 0x1be   :  { %v264_v49 = vadd.f32 %v263_v44, %v259_v46  ;;  %v1502_v50 = vpop.f32.mrb[3].mxu0  ;;  %v521_v44 = vunpack.c.h.s8.bf16 %v495_v38  ;;  %553 = vmatprep.subr.bf16.mxu0 %v522_v43  ;;  %v524_v46 = vunpack.c.l.s8.bf16 %v498_v45  ;;  %v523_v48 = vunpack.c.l.s8.bf16 %v497_v47 }
 0x1bf   :  { %v525_v50 = vunpack.c.h.s8.bf16 %v497_v47 }
 0x1c0   :  { %v265_v51 = vmax.f32 %v264_v49, 0.0  ;;  %554 = vmatpush1.bf16.msra.mxu0 %v521_v44  ;;  %v526_v49 = vunpack.c.h.s8.bf16 %v498_v45 }
 0x1c1   :  { %555 = vmatprep.subr.bf16.mxu0 %v524_v46 }
 0x1c2   :  { %v266_v52 = vrot.slane %v265_v51, 4 }
 0x1c4   :  { %v267_v53 = vadd.f32 %v266_v52, %v265_v51  ;;  %556 = vmatpush1.bf16.msra.mxu0 %v523_v48 }
 0x1c5   :  { %557 = vmatprep.subr.bf16.mxu0 %v526_v49 }
 0x1c6   :  { %v268_v54 = vrot.slane %v267_v53, 2 }
 0x1c8   :  { %v269_v55 = vadd.f32 %v268_v54, %v267_v53  ;;  %558 = vmatpush1.bf16.msra.mxu0 %v525_v50  ;;  %v499_v53 = vld [vmem:[#allocation9 + $0x60] sm:$0xff] }
 0x1c9   :  { %v527_v54 = vunpack.c.l.s8.bf16 %v499_v53 }
 0x1ca   :  { %v270_v56 = vrot.slane %v269_v55, 1 }
 0x1cc   :  { %v271_v57 = vadd.f32 %v270_v56, %v269_v55  ;;  %v529_v56 = vunpack.c.h.s8.bf16 %v499_v53 }
 0x1ce   :  { %v273_v58 = vmul.f32 0.125, %v271_v57  ;;  %v502_v57 = vld [vmem:[#allocation9 + $0x78] sm:$0xff] }
 0x1d0   :  { %v274_v59 = vsub.f32 %v265_v51, %v273_v58  ;;  %v500_v51 = vld [vmem:[#allocation9 + $0x68] sm:$0xff]  ;;  %v532_v58 = vunpack.c.l.s8.bf16 %v502_v57 }
 0x1d1   :  { %v528_v52 = vunpack.c.l.s8.bf16 %v500_v51  ;;  %v530_v55 = vunpack.c.h.s8.bf16 %v500_v51 }
 0x1d2   :  { %v275_v60 = vmul.f32 %v274_v59, %v274_v59 }
 0x1d3   :  { %559 = vmatprep.subr.bf16.mxu0 %v528_v52 }
 0x1d4   :  { %v276_v61 = vrot.slane %v275_v60, 4  ;;  %560 = vmatpush1.bf16.msra.mxu0 %v527_v54 }
 0x1d5   :  { %561 = vmatprep.subr.bf16.mxu0 %v530_v55 }
 0x1d6   :  { %v277_v62 = vadd.f32 %v276_v61, %v275_v60  ;;  %v534_v60 = vunpack.c.h.s8.bf16 %v502_v57 }
 0x1d8   :  { %v278_v63 = vrot.slane %v277_v62, 2  ;;  %562 = vmatpush1.bf16.msra.mxu0 %v529_v56 }
 0x1d9   :  { %563 = vmatprep.subr.bf16.mxu0 %v532_v58 }
 0x1da   :  { %v279_v1 = vadd.f32 %v278_v63, %v277_v62  ;;  %v2147_v63 = vld [vmem:[#allocation12 + $0x8] sm:$0xff] }
 0x1dc   :  { %v280_v2 = vrot.slane %v279_v1, 1 }
 0x1de   :  { %v281_v3 = vadd.f32 %v280_v2, %v279_v1  ;;  %v2149_v1 = vld [vmem:[#allocation12] sm:$0xff]  ;;  %v717_v2 = vunpack.c.l.s8.bf16 %v2147_v63 }
 0x1e0   :  { %v282_v4 = vmul.f32 0.125, %v281_v3  ;;  %v716_v3 = vunpack.c.l.s8.bf16 %v2149_v1  ;;  %748 = vmatprep.subr.bf16.mxu1 %v717_v2 }
 0x1e2   :  { %v283_v5 = vadd.f32 1e-05, %v282_v4  ;;  %v2153_v4 = vld [vmem:[#allocation7] sm:$0xff] }
 0x1e4   :  { %1544 = vrsqrt.f32 %v283_v5  ;;  %v2156_v5 = vsub.s32 4, %v2129_v39 }
 0x1ee   :  { %v1545_v9 = vpop.eup %1544 }
 0x1ef   :  { %v285_v10 = vmul.f32 %v1545_v9, %v274_v59  ;;  %v501_v59 = vld [vmem:[#allocation9 + $0x70] sm:$0xff]  ;;  %v367_v9 = vrot.slane %v2153_v4, %v2132_v40 }
 0x1f0   :  { %v531_v61 = vunpack.c.l.s8.bf16 %v501_v59  ;;  %v533_v62 = vunpack.c.h.s8.bf16 %v501_v59 }
 0x1f1   :  { %v290_v12 = vmul.f32 %v289_v8, %v285_v10  ;;  %v2159_v8 = vsub.s32 5, %v2129_v39  ;;  %v371_v10 = vrot.slane %v2153_v4, %v2156_v5 }
 0x1f2   :  { %564 = vmatpush1.bf16.msra.mxu0 %v531_v61 }
 0x1f3   :  { %v295_v13 = vadd.f32 %v294_v11, %v290_v12  ;;  %565 = vmatprep.subr.bf16.mxu0 %v534_v60  ;;  %v387_v11 = vrot.slane %v2153_v4, %v2135_v42  ;;  %v391_v12 = vrot.slane %v2153_v4, %v2159_v8 }
 0x1f5   :  { %v296_v14 = vpack.c.bf16 %v295_v13, %v295_v13  ;;  %v377_v13 = vrot.slane %v367_v9, %v2132_v40  ;;  %v397_v15 = vrot.slane %v387_v11, %v2135_v42  ;;  %v401_v17 = vrot.slane %v391_v12, %v2135_v42 }
 0x1f6   :  { %566 = vmatpush1.bf16.msra.mxu0 %v533_v62  ;;  %v2174_v9 = vsub.s32 6, %v2129_v39  ;;  %v447_v11 = vrot.slane %v2153_v4, %v2140_v6 }
 0x1f7   :  { %355 = vmatmul.mubr.bf16.vlgmr.msra.gmra.mrb[0].mxu1 %v296_v14  ;;  %v381_v14 = vrot.slane %v371_v10, %v2132_v40  ;;  %v2177_v10 = vsub.s32 7, %v2129_v39 }
 0x1f8   :  { %749 = vmatpush1.bf16.msra.mxu1 %v716_v3  ;;  %v451_v12 = vrot.slane %v2153_v4, %v2174_v9 }
 0x2ca   :  { %v356_v16 = vpop.f32.mrb[0].mxu1 }
 0x2cb   :  { %v382_v18 = vmul.f32 %v377_v13, %v356_v16  ;;  %v358_v19 = vpop.f32.mrb[1].mxu1  ;;  %v467_v13 = vrot.slane %v2153_v4, %v2143_v7 }
 0x2cc   :  { %v383_v20 = vmul.f32 %v381_v14, %v358_v19  ;;  %v360_v21 = vpop.f32.mrb[2].mxu1  ;;  %v471_v14 = vrot.slane %v2153_v4, %v2177_v10  ;;  %v719_v4 = vunpack.c.h.s8.bf16 %v2147_v63 }
 0x2cd   :  { %v402_v22 = vadd.f32 %v397_v15, %v382_v18  ;;  %v361_v23 = vpop.f32.mrb[3].mxu1  ;;  %v457_v15 = vrot.slane %v447_v11, %v2140_v6  ;;  %v477_v19 = vrot.slane %v467_v13, %v2143_v7  ;;  %v715_v13 = vld [vmem:[#allocation12 + $0x78] sm:$0xff] }
 0x2ce   :  { %v403_v24 = vadd.f32 %v401_v17, %v383_v20  ;;  %v461_v17 = vrot.slane %v451_v12, %v2140_v6  ;;  %v481_v21 = vrot.slane %v471_v14, %v2143_v7  ;;  %750 = vmatprep.subr.bf16.mxu1 %v719_v4  ;;  %v745_v14 = vunpack.c.l.s8.bf16 %v715_v13 }
 0x2cf   :  { %v404_v25 = vmax.f32 %v402_v22, 0.0 }
 0x2d0   :  { %v405_v27 = vmax.f32 %v403_v24, 0.0 }
 0x2d1   :  { %v406_v28 = vrot.slane %v404_v25, 4 }
 0x2d2   :  { %v412_v29 = vrot.slane %v405_v27, 4 }
 0x2d3   :  { %v407_v30 = vadd.f32 %v406_v28, %v404_v25 }
 0x2d4   :  { %v413_v31 = vadd.f32 %v412_v29, %v405_v27  ;;  %v718_v29 = vunpack.c.h.s8.bf16 %v2149_v1 }
 0x2d5   :  { %v408_v32 = vrot.slane %v407_v30, 2 }
 0x2d6   :  { %v414_v33 = vrot.slane %v413_v31, 2  ;;  %751 = vmatpush1.bf16.msra.mxu1 %v718_v29 }
 0x2d7   :  { %v409_v34 = vadd.f32 %v408_v32, %v407_v30  ;;  %v703_v30 = vld [vmem:[#allocation12 + $0x18] sm:$0xff]  ;;  %v702_v32 = vld [vmem:[#allocation12 + $0x10] sm:$0xff] }
 0x2d8   :  { %v415_v35 = vadd.f32 %v414_v33, %v413_v31  ;;  %v721_v31 = vunpack.c.l.s8.bf16 %v703_v30  ;;  %v720_v33 = vunpack.c.l.s8.bf16 %v702_v32 }
 0x2d9   :  { %v410_v36 = vrot.slane %v409_v34, 1 }
 0x2da   :  { %v416_v37 = vrot.slane %v415_v35, 1  ;;  %752 = vmatprep.subr.bf16.mxu1 %v721_v31 }
 0x2db   :  { %v411_v38 = vadd.f32 %v410_v36, %v409_v34  ;;  %753 = vmatpush1.bf16.msra.mxu1 %v720_v33  ;;  %v723_v34 = vunpack.c.h.s8.bf16 %v703_v30  ;;  %v705_v36 = vld [vmem:[#allocation12 + $0x28] sm:$0xff] }
 0x2dc   :  { %v417_v41 = vadd.f32 %v416_v37, %v415_v35  ;;  %v722_v35 = vunpack.c.h.s8.bf16 %v702_v32  ;;  %v725_v37 = vunpack.c.l.s8.bf16 %v705_v36  ;;  %v727_v63 = vunpack.c.h.s8.bf16 %v705_v36 }
 0x2dd   :  { %v418_v43 = vmul.f32 0.125, %v411_v38  ;;  %754 = vmatprep.subr.bf16.mxu1 %v723_v34  ;;  %v704_v38 = vld [vmem:[#allocation12 + $0x20] sm:$0xff] }
 0x2de   :  { %v419_v44 = vmul.f32 0.125, %v417_v41  ;;  %v724_v41 = vunpack.c.l.s8.bf16 %v704_v38  ;;  %v726_v1 = vunpack.c.h.s8.bf16 %v704_v38 }
 0x2df   :  { %v420_v45 = vsub.f32 %v404_v25, %v418_v43  ;;  %755 = vmatpush1.bf16.msra.mxu1 %v722_v35  ;;  %v707_v43 = vld [vmem:[#allocation12 + $0x38] sm:$0xff] }
 0x2e0   :  { %v421_v46 = vsub.f32 %v405_v27, %v419_v44  ;;  %756 = vmatprep.subr.bf16.mxu1 %v725_v37  ;;  %v729_v44 = vunpack.c.l.s8.bf16 %v707_v43 }
 0x2e1   :  { %v422_v47 = vmul.f32 %v420_v45, %v420_v45 }
 0x2e2   :  { %v423_v48 = vmul.f32 %v421_v46, %v421_v46 }
 0x2e3   :  { %v424_v49 = vrot.slane %v422_v47, 4  ;;  %757 = vmatpush1.bf16.msra.mxu1 %v724_v41 }
 0x2e4   :  { %v430_v50 = vrot.slane %v423_v48, 4  ;;  %758 = vmatprep.subr.bf16.mxu1 %v727_v63 }
 0x2e5   :  { %v425_v51 = vadd.f32 %v424_v49, %v422_v47  ;;  %v731_v47 = vunpack.c.h.s8.bf16 %v707_v43  ;;  %v709_v49 = vld [vmem:[#allocation12 + $0x48] sm:$0xff] }
 0x2e6   :  { %v431_v52 = vadd.f32 %v430_v50, %v423_v48  ;;  %v733_v50 = vunpack.c.l.s8.bf16 %v709_v49 }
 0x2e7   :  { %v426_v53 = vrot.slane %v425_v51, 2  ;;  %759 = vmatpush1.bf16.msra.mxu1 %v726_v1 }
 0x2e8   :  { %v432_v54 = vrot.slane %v431_v52, 2  ;;  %760 = vmatprep.subr.bf16.mxu1 %v729_v44 }
 0x2e9   :  { %v427_v55 = vadd.f32 %v426_v53, %v425_v51  ;;  %v708_v51 = vld [vmem:[#allocation12 + $0x40] sm:$0xff]  ;;  %v735_v53 = vunpack.c.h.s8.bf16 %v709_v49 }
 0x2ea   :  { %v433_v56 = vadd.f32 %v432_v54, %v431_v52  ;;  %v732_v52 = vunpack.c.l.s8.bf16 %v708_v51  ;;  %v734_v54 = vunpack.c.h.s8.bf16 %v708_v51 }
 0x2eb   :  { %v428_v57 = vrot.slane %v427_v55, 1 }
 0x2ec   :  { %v434_v58 = vrot.slane %v433_v56, 1 }
 0x2ed   :  { %v429_v59 = vadd.f32 %v428_v57, %v427_v55  ;;  %v711_v55 = vld [vmem:[#allocation12 + $0x58] sm:$0xff]  ;;  %v710_v57 = vld [vmem:[#allocation12 + $0x50] sm:$0xff] }
 0x2ee   :  { %v435_v60 = vadd.f32 %v434_v58, %v433_v56  ;;  %v737_v56 = vunpack.c.l.s8.bf16 %v711_v55  ;;  %v736_v58 = vunpack.c.l.s8.bf16 %v710_v57 }
 0x2ef   :  { %v436_v61 = vmul.f32 0.125, %v429_v59  ;;  %v739_v59 = vunpack.c.h.s8.bf16 %v711_v55 }
 0x2f0   :  { %v437_v62 = vmul.f32 0.125, %v435_v60  ;;  %v738_v60 = vunpack.c.h.s8.bf16 %v710_v57 }
 0x2f1   :  { %v438_v2 = vadd.f32 1e-05, %v436_v61  ;;  %v713_v61 = vld [vmem:[#allocation12 + $0x68] sm:$0xff] }
 0x2f2   :  { %v439_v3 = vadd.f32 1e-05, %v437_v62  ;;  %v741_v62 = vunpack.c.l.s8.bf16 %v713_v61  ;;  %v743_v11 = vunpack.c.h.s8.bf16 %v713_v61 }
 0x2f3   :  { %1546 = vrsqrt.f32 %v438_v2  ;;  %v712_v2 = vld [vmem:[#allocation12 + $0x60] sm:$0xff] }
 0x2f4   :  { %1548 = vrsqrt.f32 %v439_v3  ;;  %v740_v3 = vunpack.c.l.s8.bf16 %v712_v2  ;;  %v742_v12 = vunpack.c.h.s8.bf16 %v712_v2 }
 0x2fd   :  { %v1547_v16 = vpop.eup %1546 }
 0x2fe   :  { %v1549_v18 = vpop.eup %1548  ;;  %v442_v39 = vmul.f32 %v1547_v16, %v420_v45  ;;  %v706_v45 = vld [vmem:[#allocation12 + $0x30] sm:$0xff]  ;;  %v747_v16 = vunpack.c.h.s8.bf16 %v715_v13 }
 0x2ff   :  { %v443_v20 = vmul.f32 %v1549_v18, %v421_v46  ;;  %v728_v46 = vunpack.c.l.s8.bf16 %v706_v45  ;;  %v730_v48 = vunpack.c.h.s8.bf16 %v706_v45 }
 0x300   :  { %v462_v22 = vmul.f32 %v457_v15, %v442_v39  ;;  %v714_v15 = vld [vmem:[#allocation12 + $0x70] sm:$0xff]  ;;  %v2194_v39 = vld [vmem:[#allocation10] sm:$0xff] }
 0x301   :  { %v463_v23 = vmul.f32 %v461_v17, %v443_v20  ;;  %761 = vmatpush1.bf16.msra.mxu1 %v728_v46  ;;  %v744_v17 = vunpack.c.l.s8.bf16 %v714_v15  ;;  %v746_v18 = vunpack.c.h.s8.bf16 %v714_v15  ;;  %v584_v20 = vrot.slane %v2194_v39, %v2156_v5 }
 0x302   :  { %v482_v24 = vadd.f32 %v477_v19, %v462_v22  ;;  %762 = vmatprep.subr.bf16.mxu1 %v731_v47  ;;  %v580_v19 = vrot.slane %v2194_v39, %v2132_v40  ;;  %v604_v22 = vrot.slane %v2194_v39, %v2159_v8 }
 0x303   :  { %v483_v25 = vadd.f32 %v481_v21, %v463_v23  ;;  %v600_v21 = vrot.slane %v2194_v39, %v2135_v42 }
 0x304   :  { %v484_v28 = vpack.c.bf16 %v482_v24, %v482_v24  ;;  %v590_v23 = vrot.slane %v580_v19, %v2132_v40  ;;  %v594_v24 = vrot.slane %v584_v20, %v2132_v40  ;;  %v664_v19 = vrot.slane %v2194_v39, %v2174_v9 }
 0x305   :  { %v485_v27 = vpack.c.bf16 %v483_v25, %v483_v25  ;;  %763 = vmatpush1.bf16.msra.mxu1 %v730_v48  ;;  %v610_v25 = vrot.slane %v600_v21, %v2135_v42  ;;  %v680_v20 = vrot.slane %v2194_v39, %v2143_v7  ;;  %v684_v21 = vrot.slane %v2194_v39, %v2177_v10 }
 0x306   :  { %764 = vmatprep.subr.bf16.mxu1 %v733_v50 }
 0x307   :  { %567 = vmatprep.mubr.bf16.mxu0 %v485_v27 }
 0x308   :  { %568 = vmatmul.mubr.bf16.vlgmr.msra.gmra.mrb[4].mxu0 %v484_v28  ;;  %v614_v28 = vrot.slane %v604_v22, %v2135_v42 }
 0x309   :  { %765 = vmatpush1.bf16.msra.mxu1 %v732_v52 }
 0x30a   :  { %766 = vmatprep.subr.bf16.mxu1 %v735_v53 }
 0x30d   :  { %767 = vmatpush1.bf16.msra.mxu1 %v734_v54 }
 0x30e   :  { %768 = vmatprep.subr.bf16.mxu1 %v737_v56 }
 0x311   :  { %769 = vmatpush1.bf16.msra.mxu1 %v736_v58 }
 0x312   :  { %770 = vmatprep.subr.bf16.mxu1 %v739_v59 }
 0x315   :  { %771 = vmatpush1.bf16.msra.mxu1 %v738_v60 }
 0x316   :  { %772 = vmatprep.subr.bf16.mxu1 %v741_v62 }
 0x319   :  { %773 = vmatpush1.bf16.msra.mxu1 %v740_v3 }
 0x31a   :  { %774 = vmatprep.subr.bf16.mxu1 %v743_v11 }
 0x31d   :  { %775 = vmatpush1.bf16.msra.mxu1 %v742_v12 }
 0x31e   :  { %776 = vmatprep.subr.bf16.mxu1 %v745_v14 }
 0x321   :  { %777 = vmatpush1.bf16.msra.mxu1 %v744_v17 }
 0x322   :  { %778 = vmatprep.subr.bf16.mxu1 %v747_v16 }
 0x325   :  { %779 = vmatpush1.bf16.msra.mxu1 %v746_v18  ;;  %v660_v18 = vrot.slane %v2194_v39, %v2140_v6  ;;  %v917_v39 = vld [vmem:[#allocation15 + $0x20] sm:$0xff] }
 0x326   :  { %1503 = vmatprep.subr.bf16.mxu1 %v1870_v0 }
 0x327   :  { %v670_v22 = vrot.slane %v660_v18, %v2140_v6 }
 0x3db   :  { %v569_v27 = vpop.f32.mrb[4].mxu0 }
 0x3dc   :  { %v595_v4 = vmul.f32 %v590_v23, %v569_v27  ;;  %v571_v29 = vpop.f32.mrb[5].mxu0 }
 0x3dd   :  { %v596_v30 = vmul.f32 %v594_v24, %v571_v29  ;;  %v573_v31 = vpop.f32.mrb[6].mxu0  ;;  %v674_v24 = vrot.slane %v664_v19, %v2140_v6  ;;  %v694_v29 = vrot.slane %v684_v21, %v2143_v7 }
 0x3de   :  { %v615_v32 = vadd.f32 %v610_v25, %v595_v4  ;;  %v574_v33 = vpop.f32.mrb[7].mxu0 }
 0x3df   :  { %v616_v34 = vadd.f32 %v614_v28, %v596_v30  ;;  %v690_v28 = vrot.slane %v680_v20, %v2143_v7 }
 0x3e0   :  { %v617_v35 = vmax.f32 %v615_v32, 0.0 }
 0x3e1   :  { %v618_v36 = vmax.f32 %v616_v34, 0.0 }
 0x3e2   :  { %v619_v37 = vrot.slane %v617_v35, 4 }
 0x3e3   :  { %v625_v38 = vrot.slane %v618_v36, 4 }
 0x3e4   :  { %v620_v41 = vadd.f32 %v619_v37, %v617_v35  ;;  %v913_v37 = vld [vmem:[#allocation15] sm:$0xff] }
 0x3e5   :  { %v626_v63 = vadd.f32 %v625_v38, %v618_v36  ;;  %v921_v38 = vunpack.c.l.s8.bf16 %v913_v37 }
 0x3e6   :  { %v621_v1 = vrot.slane %v620_v41, 2 }
 0x3e7   :  { %v627_v43 = vrot.slane %v626_v63, 2 }
 0x3e8   :  { %v622_v44 = vadd.f32 %v621_v1, %v620_v41  ;;  %v930_v41 = vunpack.c.h.s8.bf16 %v917_v39  ;;  %v918_v1 = vld [vmem:[#allocation15 + $0x28] sm:$0xff] }
 0x3e9   :  { %v628_v45 = vadd.f32 %v627_v43, %v626_v63  ;;  %v922_v63 = vunpack.c.h.s8.bf16 %v913_v37  ;;  %v931_v43 = vunpack.c.l.s8.bf16 %v918_v1 }
 0x3ea   :  { %v623_v46 = vrot.slane %v622_v44, 1 }
 0x3eb   :  { %v629_v47 = vrot.slane %v628_v45, 1 }
 0x3ec   :  { %v624_v48 = vadd.f32 %v623_v46, %v622_v44  ;;  %v914_v44 = vld [vmem:[#allocation15 + $0x8] sm:$0xff]  ;;  %v932_v46 = vunpack.c.h.s8.bf16 %v918_v1 }
 0x3ed   :  { %v630_v49 = vadd.f32 %v629_v47, %v628_v45  ;;  %v923_v45 = vunpack.c.l.s8.bf16 %v914_v44  ;;  %v924_v47 = vunpack.c.h.s8.bf16 %v914_v44 }
 0x3ee   :  { %v631_v50 = vmul.f32 0.125, %v624_v48  ;;  %v919_v48 = vld [vmem:[#allocation15 + $0x30] sm:$0xff] }
 0x3ef   :  { %v632_v51 = vmul.f32 0.125, %v630_v49  ;;  %v933_v49 = vunpack.c.l.s8.bf16 %v919_v48 }
 0x3f0   :  { %v633_v52 = vsub.f32 %v617_v35, %v631_v50  ;;  %v915_v50 = vld [vmem:[#allocation15 + $0x10] sm:$0xff] }
 0x3f1   :  { %v634_v53 = vsub.f32 %v618_v36, %v632_v51  ;;  %v929_v36 = vunpack.c.l.s8.bf16 %v917_v39  ;;  %v925_v51 = vunpack.c.l.s8.bf16 %v915_v50 }
 0x3f2   :  { %v635_v54 = vmul.f32 %v633_v52, %v633_v52 }
 0x3f3   :  { %v636_v55 = vmul.f32 %v634_v53, %v634_v53  ;;  %1460 = vmatprep.subr.bf16.mxu0 %v929_v36 }
 0x3f4   :  { %v637_v56 = vrot.slane %v635_v54, 4  ;;  %1461 = vmatpush3.bf16.msra.mxu0 %v921_v38 }
 0x3f5   :  { %v643_v57 = vrot.slane %v636_v55, 4  ;;  %1462 = vmatprep.subr.bf16.mxu0 %v930_v41 }
 0x3f6   :  { %v638_v58 = vadd.f32 %v637_v56, %v635_v54  ;;  %v920_v54 = vld [vmem:[#allocation15 + $0x38] sm:$0xff] }
 0x3f7   :  { %v644_v59 = vadd.f32 %v643_v57, %v636_v55  ;;  %v935_v55 = vunpack.c.l.s8.bf16 %v920_v54  ;;  %v916_v56 = vld [vmem:[#allocation15 + $0x18] sm:$0xff]  ;;  %v936_v57 = vunpack.c.h.s8.bf16 %v920_v54 }
 0x3f8   :  { %v639_v60 = vrot.slane %v638_v58, 2  ;;  %1463 = vmatpush3.bf16.msra.mxu0 %v922_v63 }
 0x3f9   :  { %v645_v61 = vrot.slane %v644_v59, 2  ;;  %1464 = vmatprep.subr.bf16.mxu0 %v931_v43 }
 0x3fa   :  { %v640_v62 = vadd.f32 %v639_v60, %v638_v58  ;;  %v927_v58 = vunpack.c.l.s8.bf16 %v916_v56  ;;  %v2222_v60 = vld [vmem:[#allocation13] sm:$0xff] }
 0x3fb   :  { %v646_v2 = vadd.f32 %v645_v61, %v644_v59  ;;  %v928_v59 = vunpack.c.h.s8.bf16 %v916_v56  ;;  %v793_v61 = vrot.slane %v2222_v60, %v2132_v40 }
 0x3fc   :  { %v641_v3 = vrot.slane %v640_v62, 1  ;;  %1465 = vmatpush3.bf16.msra.mxu0 %v923_v45 }
 0x3fd   :  { %v647_v11 = vrot.slane %v646_v2, 1  ;;  %1466 = vmatprep.subr.bf16.mxu0 %v932_v46 }
 0x3fe   :  { %v642_v12 = vadd.f32 %v641_v3, %v640_v62  ;;  %v797_v62 = vrot.slane %v2222_v60, %v2156_v5  ;;  %v817_v3 = vrot.slane %v2222_v60, %v2159_v8 }
 0x3ff   :  { %v648_v13 = vadd.f32 %v647_v11, %v646_v2  ;;  %v813_v2 = vrot.slane %v2222_v60, %v2135_v42  ;;  %v803_v11 = vrot.slane %v793_v61, %v2132_v40  ;;  %v877_v61 = vrot.slane %v2222_v60, %v2174_v9 }
 0x400   :  { %v649_v14 = vmul.f32 0.125, %v642_v12  ;;  %1467 = vmatpush3.bf16.msra.mxu0 %v924_v47  ;;  %v807_v12 = vrot.slane %v797_v62, %v2132_v40  ;;  %v893_v62 = vrot.slane %v2222_v60, %v2143_v7 }
 0x401   :  { %v650_v15 = vmul.f32 0.125, %v648_v13  ;;  %1468 = vmatprep.subr.bf16.mxu0 %v933_v49  ;;  %v823_v13 = vrot.slane %v813_v2, %v2135_v42  ;;  %v897_v2 = vrot.slane %v2222_v60, %v2177_v10 }
 0x402   :  { %v651_v16 = vadd.f32 1e-05, %v649_v14 }
 0x403   :  { %v652_v17 = vadd.f32 1e-05, %v650_v15  ;;  %v827_v15 = vrot.slane %v817_v3, %v2135_v42 }
 0x404   :  { %1550 = vrsqrt.f32 %v651_v16  ;;  %1469 = vmatpush3.bf16.msra.mxu0 %v925_v51 }
 0x405   :  { %1552 = vrsqrt.f32 %v652_v17 }
 0x40e   :  { %v1551_v23 = vpop.eup %1550 }
 0x40f   :  { %v1553_v25 = vpop.eup %1552  ;;  %v655_v27 = vmul.f32 %v1551_v23, %v633_v52  ;;  %v934_v52 = vunpack.c.h.s8.bf16 %v919_v48 }
 0x410   :  { %v656_v4 = vmul.f32 %v1553_v25, %v634_v53  ;;  %v926_v53 = vunpack.c.h.s8.bf16 %v915_v50 }
 0x411   :  { %v675_v30 = vmul.f32 %v670_v22, %v655_v27  ;;  %1470 = vmatprep.subr.bf16.mxu0 %v934_v52 }
 0x412   :  { %v676_v31 = vmul.f32 %v674_v24, %v656_v4  ;;  %1471 = vmatpush3.bf16.msra.mxu0 %v926_v53 }
 0x413   :  { %v695_v32 = vadd.f32 %v690_v28, %v675_v30  ;;  %1472 = vmatprep.subr.bf16.mxu0 %v935_v55 }
 0x414   :  { %v696_v33 = vadd.f32 %v694_v29, %v676_v31 }
 0x415   :  { %v697_v35 = vpack.c.bf16 %v695_v32, %v695_v32 }
 0x416   :  { %v698_v34 = vpack.c.bf16 %v696_v33, %v696_v33  ;;  %1473 = vmatpush3.bf16.msra.mxu0 %v927_v58 }
 0x417   :  { %1474 = vmatprep.subr.bf16.mxu0 %v936_v57 }
 0x418   :  { %780 = vmatprep.mubr.bf16.mxu1 %v698_v34 }
 0x419   :  { %781 = vmatmul.mubr.bf16.vlgmr.msra.gmra.mrb[4].mxu1 %v697_v35 }
 0x41a   :  { %1519 = vmatprep.mubr.msk.bf16.mxu1 %vm1871_vm0, %v1870_v0  ;;  %1475 = vmatpush3.bf16.msra.mxu0 %v928_v59  ;;  %v873_v59 = vrot.slane %v2222_v60, %v2140_v6  ;;  %v1019_v60 = vld [vmem:[%s2337_s11] sm:$0xff] }
 0x41c   :  { %v883_v3 = vrot.slane %v873_v59, %v2140_v6 }
 0x4ec   :  { %v782_v14 = vpop.f32.mrb[4].mxu1 }
 0x4ed   :  { %v808_v16 = vmul.f32 %v803_v11, %v782_v14  ;;  %v784_v17 = vpop.f32.mrb[5].mxu1 }
 0x4ee   :  { %v809_v18 = vmul.f32 %v807_v12, %v784_v17  ;;  %v786_v19 = vpop.f32.mrb[6].mxu1  ;;  %v887_v12 = vrot.slane %v877_v61, %v2140_v6  ;;  %v907_v17 = vrot.slane %v897_v2, %v2143_v7 }
 0x4ef   :  { %v828_v20 = vadd.f32 %v823_v13, %v808_v16  ;;  %v787_v21 = vpop.f32.mrb[7].mxu1 }
 0x4f0   :  { %v829_v22 = vadd.f32 %v827_v15, %v809_v18  ;;  %v903_v15 = vrot.slane %v893_v62, %v2143_v7 }
 0x4f1   :  { %v830_v23 = vmax.f32 %v828_v20, 0.0 }
 0x4f2   :  { %v831_v24 = vmax.f32 %v829_v22, 0.0 }
 0x4f3   :  { %v832_v25 = vrot.slane %v830_v23, 4 }
 0x4f4   :  { %v838_v27 = vrot.slane %v831_v24, 4 }
 0x4f5   :  { %v833_v28 = vadd.f32 %v832_v25, %v830_v23  ;;  %v1024_v25 = vunpack.c.h.s8.bf16 %v1019_v60 }
 0x4f6   :  { %v839_v4 = vadd.f32 %v838_v27, %v831_v24  ;;  %v1020_v27 = vld [vmem:[%s2337_s11 + $0x8] sm:$0xff] }
 0x4f7   :  { %v834_v29 = vrot.slane %v833_v28, 2 }
 0x4f8   :  { %v840_v30 = vrot.slane %v839_v4, 2 }
 0x4f9   :  { %v835_v31 = vadd.f32 %v834_v29, %v833_v28  ;;  %v1025_v28 = vunpack.c.l.s8.bf16 %v1020_v27  ;;  %v1021_v29 = vld [vmem:[%s2337_s11 + $0x10] sm:$0xff] }
 0x4fa   :  { %v841_v32 = vadd.f32 %v840_v30, %v839_v4  ;;  %v1026_v4 = vunpack.c.h.s8.bf16 %v1020_v27  ;;  %v1027_v30 = vunpack.c.l.s8.bf16 %v1021_v29 }
 0x4fb   :  { %v836_v33 = vrot.slane %v835_v31, 1 }
 0x4fc   :  { %v842_v34 = vrot.slane %v841_v32, 1 }
 0x4fd   :  { %v837_v35 = vadd.f32 %v836_v33, %v835_v31  ;;  %v1028_v31 = vunpack.c.h.s8.bf16 %v1021_v29  ;;  %v1120_v29 = vld [vmem:[#allocation19 + $0x30] sm:$0xff] }
 0x4fe   :  { %v843_v39 = vadd.f32 %v842_v34, %v841_v32  ;;  %v1022_v32 = vld [vmem:[%s2337_s11 + $0x18] sm:$0xff] }
 0x4ff   :  { %v844_v36 = vmul.f32 0.125, %v837_v35  ;;  %v1029_v33 = vunpack.c.l.s8.bf16 %v1022_v32  ;;  %v1030_v34 = vunpack.c.h.s8.bf16 %v1022_v32  ;;  %v912_v35 = vld [vmem:[#allocation16] sm:$0xf] }
 0x500   :  { %v845_v37 = vmul.f32 0.125, %v843_v39  ;;  %v1010_v2 = vrot.slane %v912_v35, %v2140_v6 }
 0x501   :  { %v846_v38 = vsub.f32 %v830_v23, %v844_v36  ;;  %v980_v36 = vrot.slane %v912_v35, %v2132_v40 }
 0x502   :  { %v847_v41 = vsub.f32 %v831_v24, %v845_v37  ;;  %v1023_v24 = vunpack.c.l.s8.bf16 %v1019_v60 }
 0x503   :  { %v848_v63 = vmul.f32 %v846_v38, %v846_v38 }
 0x504   :  { %v849_v1 = vmul.f32 %v847_v41, %v847_v41  ;;  %1504 = vmatpush3.bf16.msra.mxu1 %v1023_v24 }
 0x505   :  { %v850_v43 = vrot.slane %v848_v63, 4  ;;  %1505 = vmatprep.subr.bf16.mxu1 %v1870_v0 }
 0x506   :  { %v856_v44 = vrot.slane %v849_v1, 4 }
 0x507   :  { %v851_v45 = vadd.f32 %v850_v43, %v848_v63 }
 0x508   :  { %v857_v46 = vadd.f32 %v856_v44, %v849_v1  ;;  %1506 = vmatpush3.bf16.msra.mxu1 %v1024_v25 }
 0x509   :  { %v852_v47 = vrot.slane %v851_v45, 2  ;;  %1507 = vmatprep.subr.bf16.mxu1 %v1870_v0 }
 0x50a   :  { %v858_v48 = vrot.slane %v857_v46, 2 }
 0x50b   :  { %v853_v49 = vadd.f32 %v852_v47, %v851_v45 }
 0x50c   :  { %v859_v50 = vadd.f32 %v858_v48, %v857_v46  ;;  %1508 = vmatpush3.bf16.msra.mxu1 %v1025_v28  ;;  %v1121_v28 = vld [vmem:[#allocation19 + $0x38] sm:$0xff] }
 0x50d   :  { %v854_v51 = vrot.slane %v853_v49, 1  ;;  %1509 = vmatprep.subr.bf16.mxu1 %v1870_v0 }
 0x50e   :  { %v860_v52 = vrot.slane %v859_v50, 1 }
 0x50f   :  { %v855_v53 = vadd.f32 %v854_v51, %v853_v49 }
 0x510   :  { %v861_v54 = vadd.f32 %v860_v52, %v859_v50  ;;  %1510 = vmatpush3.bf16.msra.mxu1 %v1026_v4  ;;  %v1151_v4 = vunpack.c.l.s8.bf16 %v1121_v28 }
 0x511   :  { %v862_v55 = vmul.f32 0.125, %v855_v53  ;;  %1511 = vmatprep.subr.bf16.mxu1 %v1870_v0 }
 0x512   :  { %v863_v56 = vmul.f32 0.125, %v861_v54 }
 0x513   :  { %v864_v57 = vadd.f32 1e-05, %v862_v55 }
 0x514   :  { %v865_v58 = vadd.f32 1e-05, %v863_v56  ;;  %1512 = vmatpush3.bf16.msra.mxu1 %v1027_v30  ;;  %v1123_v30 = vld [vmem:[#allocation19 + $0x48] sm:$0xff] }
 0x515   :  { %1554 = vrsqrt.f32 %v864_v57  ;;  %1513 = vmatprep.subr.bf16.mxu1 %v1870_v0  ;;  %v1153_v32 = vunpack.c.l.s8.bf16 %v1123_v30 }
 0x516   :  { %1556 = vrsqrt.f32 %v865_v58 }
 0x518   :  { %1514 = vmatpush3.bf16.msra.mxu1 %v1028_v31  ;;  %v1150_v31 = vunpack.c.l.s8.bf16 %v1120_v29 }
 0x519   :  { %1515 = vmatprep.subr.bf16.mxu1 %v1870_v0 }
 0x51c   :  { %1516 = vmatpush3.bf16.msra.mxu1 %v1029_v33  ;;  %v1122_v33 = vld [vmem:[#allocation19 + $0x40] sm:$0xff] }
 0x51d   :  { %1517 = vmatprep.subr.bf16.mxu1 %v1870_v0 }
 0x51f   :  { %v1555_v11 = vpop.eup %1554 }
 0x520   :  { %v1557_v13 = vpop.eup %1556  ;;  %v868_v14 = vmul.f32 %v1555_v11, %v846_v38  ;;  %1518 = vmatpush3.bf16.msra.mxu1 %v1030_v34  ;;  %v1152_v34 = vunpack.c.l.s8.bf16 %v1122_v33 }
 0x521   :  { %v869_v16 = vmul.f32 %v1557_v13, %v847_v41  ;;  %v985_v41 = vrot.slane %v912_v35, %v2135_v42 }
 0x522   :  { %v888_v18 = vmul.f32 %v883_v3, %v868_v14 }
 0x523   :  { %v889_v19 = vmul.f32 %v887_v12, %v869_v16  ;;  %v1015_v12 = vrot.slane %v912_v35, %v2143_v7  ;;  %v1115_v16 = vld [vmem:[#allocation19 + $0x8] sm:$0xff]  ;;  %v1157_v35 = vunpack.c.h.s8.bf16 %v1121_v28 }
 0x524   :  { %v908_v20 = vadd.f32 %v903_v15, %v888_v18  ;;  %v1114_v18 = vld [vmem:[#allocation19] sm:$0xff]  ;;  %v1145_v60 = vunpack.c.h.s8.bf16 %v1115_v16 }
 0x525   :  { %v909_v21 = vadd.f32 %v907_v17, %v889_v19  ;;  %v1139_v17 = vunpack.c.l.s8.bf16 %v1115_v16  ;;  %v1117_v19 = vld [vmem:[#allocation19 + $0x18] sm:$0xff]  ;;  %v1144_v24 = vunpack.c.h.s8.bf16 %v1114_v18 }
 0x526   :  { %v910_v23 = vpack.c.bf16 %v908_v20, %v908_v20  ;;  %v1138_v20 = vunpack.c.l.s8.bf16 %v1114_v18  ;;  %v1147_v25 = vunpack.c.h.s8.bf16 %v1117_v19 }
 0x527   :  { %v911_v22 = vpack.c.bf16 %v909_v21, %v909_v21  ;;  %v1141_v21 = vunpack.c.l.s8.bf16 %v1117_v19  ;;  %1186 = vmatprep.subr.bf16.mxu0 %v1139_v17 }
 0x529   :  { %969 = vmatprep.mubr.bf16.mxu0 %v911_v22  ;;  %v1116_v22 = vld [vmem:[#allocation19 + $0x10] sm:$0xff]  ;;  %1227 = vmatprep.subr.bf16.mxu1 %v1141_v21 }
 0x52a   :  { %970 = vmatmul.mubr.bf16.vlgmr.msra.gmra.mrb[8].mxu0 %v910_v23  ;;  %v1140_v23 = vunpack.c.l.s8.bf16 %v1116_v22  ;;  %v1146_v27 = vunpack.c.h.s8.bf16 %v1116_v22 }
 0x52b   :  { %1218 = vmatprep.mubr.bf16.mxu0 %v1872_v26  ;;  %1187 = vmatpush1.bf16.msra.mxu0 %v1138_v20 }
 0x52c   :  { %1188 = vmatprep.subr.bf16.mxu0 %v1145_v60 }
 0x52f   :  { %1189 = vmatpush1.bf16.msra.mxu0 %v1144_v24 }
 0x530   :  { %1190 = vmatprep.subr.bf16.mxu0 %v1151_v4 }
 0x533   :  { %1191 = vmatpush1.bf16.msra.mxu0 %v1150_v31 }
 0x534   :  { %1192 = vmatprep.subr.bf16.mxu0 %v1157_v35 }
 0x5fd   :  { %v1476_v39 = vpop.f32.mrb[8].mxu0 }
 0x5fe   :  { %v1477_v37 = vpop.f32.mrb[9].mxu0 }
 0x5ff   :  { %v1478_v38 = vadd.f32 %v1477_v37, %v1476_v39  ;;  %v1479_v63 = vpop.f32.mrb[10].mxu0  ;;  %v1156_v39 = vunpack.c.h.s8.bf16 %v1120_v29  ;;  %v1158_v37 = vunpack.c.h.s8.bf16 %v1122_v33 }
 0x600   :  { %v1480_v1 = vpop.f32.mrb[11].mxu0  ;;  %v1126_v63 = vld [vmem:[#allocation19 + $0x60] sm:$0xff] }
 0x601   :  { %v981_v43 = vmul.f32 %v1478_v38, %v980_v36  ;;  %v1159_v36 = vunpack.c.h.s8.bf16 %v1123_v30  ;;  %1193 = vmatpush1.bf16.msra.mxu0 %v1156_v39  ;;  %v1127_v38 = vld [vmem:[#allocation19 + $0x68] sm:$0xff]  ;;  %v1129_v1 = vld [vmem:[#allocation19 + $0x78] sm:$0xff] }
 0x603   :  { %v986_v44 = vadd.f32 %v985_v41, %v981_v43  ;;  %v1163_v41 = vunpack.c.l.s8.bf16 %v1127_v38  ;;  %v1162_v43 = vunpack.c.l.s8.bf16 %v1126_v63 }
 0x605   :  { %v987_v45 = vmax.f32 %v986_v44, 0.0  ;;  %v1165_v44 = vunpack.c.l.s8.bf16 %v1129_v1  ;;  %1194 = vmatprep.subr.bf16.mxu0 %v1163_v41 }
 0x606   :  { %1195 = vmatpush1.bf16.msra.mxu0 %v1162_v43 }
 0x607   :  { %v988_v46 = vrot.slane %v987_v45, 4 }
 0x609   :  { %v989_v47 = vadd.f32 %v988_v46, %v987_v45 }
 0x60b   :  { %v990_v48 = vrot.slane %v989_v47, 2 }
 0x60d   :  { %v991_v49 = vadd.f32 %v990_v48, %v989_v47  ;;  %v1169_v47 = vunpack.c.h.s8.bf16 %v1127_v38  ;;  %v1168_v48 = vunpack.c.h.s8.bf16 %v1126_v63 }
 0x60f   :  { %v992_v50 = vrot.slane %v991_v49, 1  ;;  %1196 = vmatprep.subr.bf16.mxu0 %v1169_v47  ;;  %v1125_v47 = vld [vmem:[#allocation19 + $0x58] sm:$0xff] }
 0x610   :  { %1197 = vmatpush1.bf16.msra.mxu0 %v1168_v48 }
 0x611   :  { %v993_v0 = vadd.f32 %v992_v50, %v991_v49  ;;  %v1171_v49 = vunpack.c.h.s8.bf16 %v1129_v1  ;;  %v1118_v1 = vld [vmem:[#allocation19 + $0x20] sm:$0xff] }
 0x612   :  { %v1148_v48 = vunpack.c.h.s8.bf16 %v1118_v1 }
 0x613   :  { %v994_v51 = vmul.f32 0.125, %v993_v0  ;;  %v1133_v0 = vld [vmem:[#allocation19 + $0x98] sm:$0xff] }
 0x615   :  { %v995_v52 = vsub.f32 %v987_v45, %v994_v51  ;;  %v1128_v45 = vld [vmem:[#allocation19 + $0x70] sm:$0xff]  ;;  %v1175_v51 = vunpack.c.l.s8.bf16 %v1133_v0 }
 0x616   :  { %v1164_v46 = vunpack.c.l.s8.bf16 %v1128_v45  ;;  %v1170_v50 = vunpack.c.h.s8.bf16 %v1128_v45 }
 0x617   :  { %v996_v53 = vmul.f32 %v995_v52, %v995_v52  ;;  %1198 = vmatprep.subr.bf16.mxu0 %v1175_v51  ;;  %v1161_v51 = vunpack.c.h.s8.bf16 %v1125_v47 }
 0x619   :  { %v997_v54 = vrot.slane %v996_v53, 4 }
 0x61b   :  { %v998_v55 = vadd.f32 %v997_v54, %v996_v53  ;;  %v1135_v53 = vld [vmem:[#allocation19 + $0xa8] sm:$0xff] }
 0x61d   :  { %v999_v56 = vrot.slane %v998_v55, 2 }
 0x61f   :  { %v1000_v57 = vadd.f32 %v999_v56, %v998_v55  ;;  %v1177_v55 = vunpack.c.l.s8.bf16 %v1135_v53  ;;  %v1134_v56 = vld [vmem:[#allocation19 + $0xa0] sm:$0xff] }
 0x621   :  { %v1001_v58 = vrot.slane %v1000_v57, 1 }
 0x623   :  { %v1002_v59 = vadd.f32 %v1001_v58, %v1000_v57  ;;  %v1176_v57 = vunpack.c.l.s8.bf16 %v1134_v56  ;;  %v1181_v58 = vunpack.c.h.s8.bf16 %v1133_v0 }
 0x625   :  { %v1003_v61 = vmul.f32 0.125, %v1002_v59 }
 0x627   :  { %v1004_v62 = vadd.f32 1e-05, %v1003_v61  ;;  %v1183_v61 = vunpack.c.h.s8.bf16 %v1135_v53 }
 0x629   :  { %1558 = vrsqrt.f32 %v1004_v62  ;;  %v1119_v62 = vld [vmem:[#allocation19 + $0x28] sm:$0xff] }
 0x633   :  { %v1559_v3 = vpop.eup %1558 }
 0x634   :  { %v1006_v11 = vmul.f32 %v1559_v3, %v995_v52  ;;  %v1132_v52 = vld [vmem:[#allocation19 + $0x90] sm:$0xff]  ;;  %v1143_v3 = vunpack.c.l.s8.bf16 %v1119_v62 }
 0x635   :  { %v1174_v54 = vunpack.c.l.s8.bf16 %v1132_v52  ;;  %v1180_v59 = vunpack.c.h.s8.bf16 %v1132_v52  ;;  %v1131_v52 = vld [vmem:[#allocation19 + $0x88] sm:$0xff] }
 0x636   :  { %v1011_v13 = vmul.f32 %v1010_v2, %v1006_v11  ;;  %v1182_v2 = vunpack.c.h.s8.bf16 %v1134_v56  ;;  %v1018_v11 = vld [vmem:[#allocation18] sm:$0xf] }
 0x637   :  { %1199 = vmatpush1.bf16.msra.mxu0 %v1174_v54  ;;  %v1109_v41 = vrot.slane %v1018_v11, %v2143_v7  ;;  %v1167_v54 = vunpack.c.l.s8.bf16 %v1131_v52 }
 0x638   :  { %v1016_v14 = vadd.f32 %v1015_v12, %v1011_v13  ;;  %1200 = vmatprep.subr.bf16.mxu0 %v1181_v58  ;;  %v1074_v12 = vrot.slane %v1018_v11, %v2132_v40  ;;  %v1079_v13 = vrot.slane %v1018_v11, %v2135_v42  ;;  %v1137_v58 = vld [vmem:[#allocation19 + $0xb8] sm:$0xff] }
 0x63a   :  { %v1017_v15 = vpack.c.bf16 %v1016_v14, %v1016_v14 }
 0x63b   :  { %1201 = vmatpush1.bf16.msra.mxu0 %v1180_v59  ;;  %v1179_v59 = vunpack.c.l.s8.bf16 %v1137_v58 }
 0x63c   :  { %1520 = vmatmul.mubr.bf16.vlgmr.msra.gmra.mrb[8].mxu1 %v1017_v15  ;;  %1268 = vmatprep.subr.bf16.mxu0 %v1143_v3 }
 0x63d   :  { %1259 = vmatprep.mubr.bf16.mxu1 %v1872_v26  ;;  %1228 = vmatpush1.bf16.msra.mxu1 %v1140_v23 }
 0x63e   :  { %1229 = vmatprep.subr.bf16.mxu1 %v1147_v25 }
 0x641   :  { %1230 = vmatpush1.bf16.msra.mxu1 %v1146_v27 }
 0x642   :  { %1231 = vmatprep.subr.bf16.mxu1 %v1153_v32 }
 0x645   :  { %1232 = vmatpush1.bf16.msra.mxu1 %v1152_v34 }
 0x646   :  { %1233 = vmatprep.subr.bf16.mxu1 %v1159_v36  ;;  %v1104_v36 = vrot.slane %v1018_v11, %v2140_v6  ;;  %v1112_v11 = vld [vmem:[%s2340_s14] sm:$0xff] }
 0x649   :  { %1234 = vmatpush1.bf16.msra.mxu1 %v1158_v37 }
 0x64a   :  { %1235 = vmatprep.subr.bf16.mxu1 %v1165_v44  ;;  %v1142_v44 = vunpack.c.l.s8.bf16 %v1118_v1 }
 0x64d   :  { %1236 = vmatpush1.bf16.msra.mxu1 %v1164_v46  ;;  %v1149_v46 = vunpack.c.h.s8.bf16 %v1119_v62 }
 0x64e   :  { %1237 = vmatprep.subr.bf16.mxu1 %v1171_v49  ;;  %v1155_v49 = vunpack.c.l.s8.bf16 %v1125_v47 }
 0x651   :  { %1238 = vmatpush1.bf16.msra.mxu1 %v1170_v50  ;;  %v1124_v50 = vld [vmem:[#allocation19 + $0x50] sm:$0xff] }
 0x652   :  { %1239 = vmatprep.subr.bf16.mxu1 %v1177_v55  ;;  %v1154_v0 = vunpack.c.l.s8.bf16 %v1124_v50  ;;  %v1160_v53 = vunpack.c.h.s8.bf16 %v1124_v50  ;;  %v1130_v55 = vld [vmem:[#allocation19 + $0x80] sm:$0xff] }
 0x653   :  { %v1166_v56 = vunpack.c.l.s8.bf16 %v1130_v55 }
 0x655   :  { %1240 = vmatpush1.bf16.msra.mxu1 %v1176_v57  ;;  %v1173_v57 = vunpack.c.h.s8.bf16 %v1131_v52 }
 0x656   :  { %1241 = vmatprep.subr.bf16.mxu1 %v1183_v61  ;;  %v1136_v61 = vld [vmem:[#allocation19 + $0xb0] sm:$0xff] }
 0x657   :  { %v1178_v62 = vunpack.c.l.s8.bf16 %v1136_v61  ;;  %v1184_v3 = vunpack.c.h.s8.bf16 %v1136_v61 }
 0x659   :  { %1242 = vmatpush1.bf16.msra.mxu1 %v1182_v2  ;;  %v1185_v2 = vunpack.c.h.s8.bf16 %v1137_v58 }
 0x70f   :  { %v1065_v14 = vpop.f32.mrb[8].mxu1 }
 0x710   :  { %v1075_v15 = vmul.f32 %v1074_v12, %v1065_v14  ;;  %v1521_v16 = vpop.f32.mrb[9].mxu1  ;;  %v1314_v12 = vrot.slane %v1112_v11, %v2132_v40  ;;  %v1318_v14 = vrot.slane %v1112_v11, %v2140_v6 }
 0x711   :  { %v1068_v17 = vpop.f32.mrb[10].mxu1  ;;  %v1374_v16 = vrot.slane %v1112_v11, %v2135_v42 }
 0x712   :  { %v1080_v18 = vadd.f32 %v1079_v13, %v1075_v15  ;;  %v1522_v19 = vpop.f32.mrb[11].mxu1  ;;  %v1322_v13 = vrot.slane %v1112_v11, %v2156_v5  ;;  %v1326_v15 = vrot.slane %v1112_v11, %v2174_v9  ;;  %v1382_v17 = vrot.slane %v1112_v11, %v2159_v8 }
 0x713   :  { %v1386_v19 = vrot.slane %v1112_v11, %v2177_v10 }
 0x714   :  { %v1081_v20 = vmax.f32 %v1080_v18, 0.0  ;;  %v1378_v18 = vrot.slane %v1112_v11, %v2143_v7  ;;  %v1356_v5 = vrot.slane %v1326_v15, %v2132_v40  ;;  %v1412_v9 = vrot.slane %v1382_v17, %v2135_v42 }
 0x716   :  { %v1082_v21 = vrot.slane %v1081_v20, 4  ;;  %v1408_v8 = vrot.slane %v1378_v18, %v2135_v42 }
 0x718   :  { %v1083_v22 = vadd.f32 %v1082_v21, %v1081_v20  ;;  %v1352_v21 = vrot.slane %v1322_v13, %v2132_v40 }
 0x71a   :  { %v1084_v23 = vrot.slane %v1083_v22, 2 }
 0x71c   :  { %v1085_v60 = vadd.f32 %v1084_v23, %v1083_v22  ;;  %v1348_v22 = vrot.slane %v1318_v14, %v2132_v40  ;;  %v1404_v23 = vrot.slane %v1374_v16, %v2135_v42 }
 0x71e   :  { %v1086_v24 = vrot.slane %v1085_v60, 1 }
 0x720   :  { %v1087_v25 = vadd.f32 %v1086_v24, %v1085_v60 }
 0x722   :  { %v1088_v27 = vmul.f32 0.125, %v1087_v25  ;;  %v1416_v25 = vrot.slane %v1386_v19, %v2135_v42 }
 0x724   :  { %v1089_v28 = vsub.f32 %v1081_v20, %v1088_v27  ;;  %v1344_v20 = vrot.slane %v1314_v12, %v2132_v40 }
 0x726   :  { %v1090_v4 = vmul.f32 %v1089_v28, %v1089_v28 }
 0x728   :  { %v1091_v29 = vrot.slane %v1090_v4, 4 }
 0x72a   :  { %v1092_v30 = vadd.f32 %v1091_v29, %v1090_v4 }
 0x72c   :  { %v1093_v31 = vrot.slane %v1092_v30, 2 }
 0x72e   :  { %v1094_v32 = vadd.f32 %v1093_v31, %v1092_v30 }
 0x730   :  { %v1095_v33 = vrot.slane %v1094_v32, 1 }
 0x732   :  { %v1096_v34 = vadd.f32 %v1095_v33, %v1094_v32 }
 0x734   :  { %v1097_v35 = vmul.f32 0.125, %v1096_v34 }
 0x736   :  { %v1098_v39 = vadd.f32 1e-05, %v1097_v35 }
 0x738   :  { %1560 = vrsqrt.f32 %v1098_v39 }
 0x742   :  { %v1561_v37 = vpop.eup %1560 }
 0x743   :  { %v1100_v38 = vmul.f32 %v1561_v37, %v1089_v28 }
 0x745   :  { %v1105_v63 = vmul.f32 %v1104_v36, %v1100_v38 }
 0x747   :  { %v1110_v43 = vadd.f32 %v1109_v41, %v1105_v63 }
 0x749   :  { %v1111_v45 = vpack.c.bf16 %v1110_v43, %v1110_v43  ;;  %v1113_v43 = vld [vmem:[%s2340_s14 + $0x8] sm:$0xf] }
 0x74a   :  { %v1394_v47 = vrot.slane %v1113_v43, %v2143_v7 }
 0x74b   :  { %1219 = vmatmul.mubr.bf16.vlgmr.msra.gmra.mrb[12].mxu0 %v1111_v45  ;;  %1260 = vmatmul.mubr.bf16.vlgmr.msra.gmra.mrb[12].mxu1 %v1111_v45 }
 0x74c   :  { %1269 = vmatpush1.bf16.msra.mxu0 %v1142_v44  ;;  %1300 = vmatprep.mubr.bf16.mxu0 %v1872_v26  ;;  %v1172_v26 = vunpack.c.h.s8.bf16 %v1130_v55  ;;  %v1330_v44 = vrot.slane %v1113_v43, %v2132_v40 }
 0x74d   :  { %1270 = vmatprep.subr.bf16.mxu0 %v1149_v46  ;;  %v1390_v46 = vrot.slane %v1113_v43, %v2135_v42 }
 0x74f   :  { %v1420_v50 = vrot.slane %v1390_v46, %v2135_v42 }
 0x750   :  { %1271 = vmatpush1.bf16.msra.mxu0 %v1148_v48  ;;  %v1360_v48 = vrot.slane %v1330_v44, %v2132_v40 }
 0x751   :  { %1272 = vmatprep.subr.bf16.mxu0 %v1155_v49 }
 0x754   :  { %1273 = vmatpush1.bf16.msra.mxu0 %v1154_v0 }
 0x755   :  { %1274 = vmatprep.subr.bf16.mxu0 %v1161_v51  ;;  %v1424_v51 = vrot.slane %v1394_v47, %v2135_v42 }
 0x758   :  { %1275 = vmatpush1.bf16.msra.mxu0 %v1160_v53 }
 0x759   :  { %1276 = vmatprep.subr.bf16.mxu0 %v1167_v54 }
 0x75c   :  { %1277 = vmatpush1.bf16.msra.mxu0 %v1166_v56 }
 0x75d   :  { %1278 = vmatprep.subr.bf16.mxu0 %v1173_v57 }
 0x760   :  { %1279 = vmatpush1.bf16.msra.mxu0 %v1172_v26 }
 0x761   :  { %1280 = vmatprep.subr.bf16.mxu0 %v1179_v59 }
 0x764   :  { %1281 = vmatpush1.bf16.msra.mxu0 %v1178_v62 }
 0x765   :  { %1282 = vmatprep.subr.bf16.mxu0 %v1185_v2 }
 0x768   :  { %1283 = vmatpush1.bf16.msra.mxu0 %v1184_v3 }
 0x76b   :  { %1301 = vmatmul.mubr.bf16.vlgmr.msra.gmra.mrb[16].mxu0 %v1111_v45  ;;  %v1334_v45 = vrot.slane %v1113_v43, %v2140_v6 }
 0x76d   :  { %v1364_v49 = vrot.slane %v1334_v45, %v2132_v40 }
 0x81e   :  { %v1220_v60 = vpop.f32.mrb[12].mxu0  ;;  %v1261_v24 = vpop.f32.mrb[12].mxu1 }
 0x81f   :  { %v1365_v27 = vmul.f32 %v1344_v20, %v1220_v60  ;;  %v1367_v10 = vmul.f32 %v1352_v21, %v1261_v24  ;;  %v1222_v28 = vpop.f32.mrb[13].mxu0  ;;  %v1263_v4 = vpop.f32.mrb[13].mxu1 }
 0x820   :  { %v1366_v29 = vmul.f32 %v1348_v22, %v1222_v28  ;;  %v1368_v30 = vmul.f32 %v1356_v5, %v1263_v4  ;;  %v1224_v31 = vpop.f32.mrb[14].mxu0  ;;  %v1265_v32 = vpop.f32.mrb[14].mxu1 }
 0x821   :  { %v1425_v33 = vadd.f32 %v1404_v23, %v1365_v27  ;;  %v1427_v34 = vadd.f32 %v1412_v9, %v1367_v10  ;;  %v1225_v35 = vpop.f32.mrb[15].mxu0  ;;  %v1266_v39 = vpop.f32.mrb[15].mxu1 }
 0x822   :  { %v1426_v36 = vadd.f32 %v1408_v8, %v1366_v29  ;;  %v1428_v37 = vadd.f32 %v1416_v25, %v1368_v30 }
 0x823   :  { %1562 = vtanh.f32 %v1425_v33 }
 0x824   :  { %1564 = vtanh.f32 %v1427_v34 }
 0x825   :  { %1566 = vtanh.f32 %v1426_v36 }
 0x826   :  { %1568 = vtanh.f32 %v1428_v37 }
 0x82d   :  { %v1563_v38 = vpop.eup %1562 }
 0x82e   :  { %v1565_v41 = vpop.eup %1564  ;;  %1437 = vst [vmem:[%s2341_s15] sm:$0xff] %v1563_v38 }
 0x82f   :  { %v1567_v63 = vpop.eup %1566  ;;  %1439 = vst [vmem:[%s2341_s15 + $0x10] sm:$0xff] %v1565_v41 }
 0x830   :  { %v1569_v1 = vpop.eup %1568  ;;  %1438 = vst [vmem:[%s2341_s15 + $0x8] sm:$0xff] %v1567_v63 }
 0x831   :  { %1440 = vst [vmem:[%s2341_s15 + $0x18] sm:$0xff] %v1569_v1 }
 0x83e   :  { %v1302_v0 = vpop.f32.mrb[16].mxu0 }
 0x83f   :  { %v1369_v52 = vmul.f32 %v1360_v48, %v1302_v0  ;;  %v1304_v53 = vpop.f32.mrb[17].mxu0 }
 0x840   :  { %v1370_v54 = vmul.f32 %v1364_v49, %v1304_v53  ;;  %v1306_v55 = vpop.f32.mrb[18].mxu0 }
 0x841   :  { %v1429_v56 = vadd.f32 %v1420_v50, %v1369_v52  ;;  %v1307_v57 = vpop.f32.mrb[19].mxu0 }
 0x842   :  { %v1430_v6 = vadd.f32 %v1424_v51, %v1370_v54 }
 0x843   :  { %1570 = vtanh.f32 %v1429_v56 }
 0x844   :  { %1572 = vtanh.f32 %v1430_v6 }
 0x84d   :  { %v1571_v58 = vpop.eup %1570 }
 0x84e   :  { %v1573_v7 = vpop.eup %1572  ;;  %1441 = vst [vmem:[%s2341_s15 + $0x20] sm:$0xff] %v1571_v58 }
 0x84f   :  { %1442 = vst [vmem:[%s2341_s15 + $0x28] sm:$0xff] %v1573_v7 }
 0x850   :  { %1447 = vsyncpa [#allocation3], 1 }
 0x851   :  { %1448 = vsyncpa [#allocation5], 1 }
 0x852   :  { %1449 = vsyncpa [#allocation8], 1 }
 0x853   :  { %1450 = vsyncpa [#allocation11], 1 }
 0x854   :  { %1451 = vsyncpa [#allocation14], 1 }
 0x855   :  { %1452 = vsyncpa [#allocation17], 1 }
 0x856   :  { %1453 = vsyncpa [#allocation20], 1 }

</bundles_post_ra>
